<compile_context>
chip_gen: v5e
topology: v5e:2x2
jax: 0.10.0
libtpu: 0.0.40
codegen_flags: <defaults>
</compile_context>

<pallas_src>
import jax
import jax.numpy as jnp
import numpy as np
from jax.experimental import pallas as pl
from jax.experimental.pallas import tpu as pltpu

LN_EPS = 1e-5
_HIGHEST = jax.lax.Precision.HIGHEST


def lwe_kernel(x_ref, wm_ref, w1t_ref, w2t_ref, vec_ref, o_ref):
    x = x_ref[...]          # (Bt, C, HW)  native dtype (f32 or bf16)
    wm = wm_ref[...]        # (C, 1)   conv_mask weight, f32, sublane-major
    w1t = w1t_ref[...]      # (C, 2P)  [add_w1 ; mul_w1] transposed, f32
    w2t = w2t_ref[...]      # (2P, C)  rows 0:P = add_w2.T, rows P:2P = mul_w2.T
    vec = vec_ref[...]      # (8, C)   packed small vectors (see pack_params)

    P2 = w1t.shape[1]
    P = P2 // 2

    # ---- spatial attention logits: VPU multiply + XLU sublane reduce ------
    # (x is promoted to f32 elementwise inside the fused multiply-reduce.)
    bm = vec[0:1, 0:1]                                        # (1, 1)
    logits = jnp.sum(x * wm[None, :, :], axis=1) + bm         # (Bt, HW) f32
    logits = logits - jnp.max(logits, axis=-1, keepdims=True)
    e = jnp.exp(logits)                                       # (Bt, HW)
    denom = jnp.sum(e, axis=-1, keepdims=True)                # (Bt, 1)

    # ---- context with deferred softmax normalization ----------------------
    # ctx = sum_s x * softmax(logits)_s  ==  (sum_s x * e_s) / sum_s e_s
    ctx = jnp.sum(x * e[:, None, :], axis=-1) / denom         # (Bt, C) f32

    # ---- fused first 1x1 conv for both branches: (Bt, C) @ (C, 2P) --------
    b1 = vec[1:2, :P2]
    g = vec[2:3, :P2]
    be = vec[3:4, :P2]
    h = jnp.dot(ctx, w1t, preferred_element_type=jnp.float32,
                precision=_HIGHEST) + b1                       # (Bt, 2P)

    def ln_relu(hh, gg, bb):
        mu = jnp.mean(hh, axis=-1, keepdims=True)
        var = jnp.mean(jnp.square(hh - mu), axis=-1, keepdims=True)
        hn = (hh - mu) * jax.lax.rsqrt(var + LN_EPS) * gg + bb
        return jnp.maximum(hn, 0.0)

    h_add = ln_relu(h[:, :P], g[:, :P], be[:, :P])             # (Bt, P)
    h_mul = ln_relu(h[:, P:], g[:, P:], be[:, P:])             # (Bt, P)

    b2a = vec[4:5, :]
    b2m = vec[5:6, :]
    add_t = jnp.dot(h_add, w2t[:P, :], preferred_element_type=jnp.float32,
                    precision=_HIGHEST) + b2a                  # (Bt, C)
    mul_t = jax.nn.sigmoid(
        jnp.dot(h_mul, w2t[P:, :], preferred_element_type=jnp.float32,
                precision=_HIGHEST) + b2m)                     # (Bt, C)

    # out = x * sigmoid(channel_mul) + channel_add  (broadcast over spatial)
    o_ref[...] = (x * mul_t[:, :, None] + add_t[:, :, None]).astype(o_ref.dtype)


def init_params(key, C):
    P = C // 4
    ks = jax.random.split(key, 12)

    def nrm(k, shape, scale=0.1):
        return (scale * jax.random.normal(k, shape)).astype(jnp.float32)

    return {
        "wm": nrm(ks[0], (1, C)),          # conv_mask.weight (1, C, 1, 1)
        "bm": nrm(ks[1], (1, 1)),          # conv_mask.bias
        "add": {
            "w1": nrm(ks[2], (P, C)), "b1": nrm(ks[3], (P, 1)),
            "g":  jnp.ones((P, 1), jnp.float32), "be": jnp.zeros((P, 1), jnp.float32),
            "w2": nrm(ks[4], (C, P)), "b2": nrm(ks[5], (C, 1)),
        },
        "mul": {
            "w1": nrm(ks[6], (P, C)), "b1": nrm(ks[7], (P, 1)),
            "g":  jnp.ones((P, 1), jnp.float32), "be": jnp.zeros((P, 1), jnp.float32),
            "w2": nrm(ks[8], (C, P)), "b2": nrm(ks[9], (C, 1)),
        },
    }


def pack_params(params, C):
    """Pack the 14 parameter arrays into 4 DMA-friendly f32 buffers."""
    P = C // 4
    a, m = params["add"], params["mul"]

    wm_col = params["wm"].reshape(C, 1).astype(jnp.float32)             # (C, 1)
    w1t = jnp.concatenate([a["w1"], m["w1"]], axis=0).T                 # (C, 2P)
    w2t = jnp.concatenate([a["w2"].T, m["w2"].T], axis=0)               # (2P, C)

    vec = jnp.zeros((8, C), jnp.float32)
    vec = vec.at[0, 0].set(params["bm"].reshape(()))
    vec = vec.at[1, :2 * P].set(jnp.concatenate([a["b1"].reshape(P), m["b1"].reshape(P)]))
    vec = vec.at[2, :2 * P].set(jnp.concatenate([a["g"].reshape(P), m["g"].reshape(P)]))
    vec = vec.at[3, :2 * P].set(jnp.concatenate([a["be"].reshape(P), m["be"].reshape(P)]))
    vec = vec.at[4, :C].set(a["b2"].reshape(C))
    vec = vec.at[5, :C].set(m["b2"].reshape(C))
    return wm_col, w1t, w2t, vec


def _tpu_budgets():
    """Generation-aware (target block bytes, vmem limit bytes, min grid steps)."""
    try:
        vmem_cap = int(pltpu.get_tpu_info().vmem_capacity_bytes)
    except Exception:
        vmem_cap = 64 << 20            # conservative fallback (v7x-class)
    if vmem_cap >= (128 << 20):        # v5e / v6e: 128 MiB VMEM, 1 TensorCore
        return 14 << 20, 96 << 20, 2
    # v7x-class: 64 MiB VMEM, 2 TensorCores share the "parallel" grid axis,
    # so keep >= 4 steps (>= 2 per core) for double-buffering when B allows.
    return 9 << 20, 48 << 20, 4


def _choose_bt(B, per_b_bytes, target_block_bytes, min_steps):
    """Batch rows per block: as big as the target block allows, while keeping
    at least `min_steps` pipeline steps when the batch is large enough."""
    cap = max(1, int(target_block_bytes) // max(1, per_b_bytes))
    bt = min(B, cap)
    if B >= min_steps:
        bt = min(bt, max(1, B // min_steps))
    return bt


def lwe_forward(x, params, *, bt=None, single_buffer_params=True):
    B, C, H, W = x.shape
    HW = H * W
    P = C // 4
    x2 = x.reshape(B, C, HW)
    wm_col, w1t, w2t, vec = pack_params(params, C)

    itemsize = jnp.dtype(x.dtype).itemsize
    param_bytes = 4 * (wm_col.size + w1t.size + w2t.size + vec.size)

    target_block, vmem_limit, min_steps = _tpu_budgets()
    # Budget: 2 in + 2 out x-tiles + fused-pass temporaries + parameter slabs.
    param_factor = 1 if single_buffer_params else 2
    block_budget = max(1 << 20, (vmem_limit - param_factor * param_bytes) // 6)
    if bt is None:
        bt = _choose_bt(B, C * HW * itemsize, min(target_block, block_budget), min_steps)
    bt = max(1, min(int(bt), B))
    grid = (pl.cdiv(B, bt),)   # ragged last block is masked by Pallas

    # TODO(synk): for very large C*HW (single batch row > the block budget),
    # add an HW grid axis ("arbitrary") with an online-softmax running
    # max/sum + ctx accumulator instead of one full (C, HW) slab per step.

    cost = pl.CostEstimate(
        flops=6 * B * C * HW + 8 * B * C * P,
        transcendentals=B * (HW + C + 2 * P),
        bytes_accessed=2 * B * C * HW * itemsize + param_bytes,
    )

    def _call(single_buffer):
        def _pspec(shape):
            # Constant index_map -> single-buffering saves a duplicate copy of
            # the weight slabs in VMEM (matters for large C, esp. on v7x).
            if single_buffer and hasattr(pl, "Buffered"):
                try:
                    return pl.BlockSpec(shape, lambda b: (0, 0),
                                        pipeline_mode=pl.Buffered(1))
                except TypeError:
                    pass
            return pl.BlockSpec(shape, lambda b: (0, 0))

        # Note: input_output_aliases={0: 0} could donate x's HBM buffer to the
        # output (footprint win only); left off so callers may reuse x.
        # A pl.Buffered(3) sweep on the x in_spec is a cheap extra knob on v7x.
        return pl.pallas_call(
            lwe_kernel,
            out_shape=jax.ShapeDtypeStruct((B, C, HW), x.dtype),
            grid_spec=pltpu.PrefetchScalarGridSpec(
                num_scalar_prefetch=0,
                grid=grid,
                in_specs=[
                    pl.BlockSpec((bt, C, HW), lambda b: (b, 0, 0)),
                    _pspec(wm_col.shape),
                    _pspec(w1t.shape),
                    _pspec(w2t.shape),
                    _pspec(vec.shape),
                ],
                out_specs=pl.BlockSpec((bt, C, HW), lambda b: (b, 0, 0)),
            ),
            compiler_params=pltpu.CompilerParams(
                dimension_semantics=("parallel",),
                vmem_limit_bytes=int(vmem_limit),
            ),
            cost_estimate=cost,
        )(x2, wm_col, w1t, w2t, vec)

    try:
        out = _call(single_buffer_params)
    except Exception:
        if not single_buffer_params:
            raise
        out = _call(False)   # retry with default double-buffered param specs
    return out.reshape(B, C, H, W)


def lwe_reference(x, params):
    """Pure-JAX reference mirroring the PyTorch forward (f32 compute)."""
    B, C, H, W = x.shape
    HW = H * W
    xf = x.astype(jnp.float32).reshape(B, C, HW)
    wmv = params["wm"].reshape(C)
    logits = jnp.sum(xf * wmv[None, :, None], axis=1) + params["bm"].reshape(())
    p = jax.nn.softmax(logits, axis=-1)                  # (B, HW)
    ctx = jnp.sum(xf * p[:, None, :], axis=-1)           # (B, C)

    def branch(ctx, pr):
        h = jnp.dot(ctx, pr["w1"].T, precision=_HIGHEST) + pr["b1"].reshape(-1)
        mu = h.mean(-1, keepdims=True)
        var = ((h - mu) ** 2).mean(-1, keepdims=True)
        h = (h - mu) / jnp.sqrt(var + LN_EPS) * pr["g"].reshape(-1) + pr["be"].reshape(-1)
        h = jnp.maximum(h, 0.0)
        return jnp.dot(h, pr["w2"].T, precision=_HIGHEST) + pr["b2"].reshape(-1)

    add_t = branch(ctx, params["add"])
    mul_t = jax.nn.sigmoid(branch(ctx, params["mul"]))
    out = xf * mul_t[:, :, None] + add_t[:, :, None]
    return out.reshape(B, C, H, W)


if __name__ == "__main__":
    key = jax.random.PRNGKey(0)
    kx, kp = jax.random.split(key)

    B, C, H, W = 2, 32, 16, 16                           # inplanes=32 -> planes=8
    params = init_params(kp, C)
    x32 = jax.random.normal(kx, (B, C, H, W), dtype=jnp.float32)

    # f32 path: exact softmax normalization -> tight tolerance.
    out32 = jax.block_until_ready(lwe_forward(x32, params))
    ref32 = lwe_reference(x32, params)
    np.testing.assert_allclose(np.asarray(out32), np.asarray(ref32),
                               rtol=1e-4, atol=1e-4)

    # bf16 I/O path (halves HBM traffic); compute stays f32 in-kernel.
    xbf = x32.astype(jnp.bfloat16)
    outbf = jax.block_until_ready(lwe_forward(xbf, params))
    refbf = lwe_reference(xbf, params)
    np.testing.assert_allclose(np.asarray(outbf).astype(np.float32),
                               np.asarray(refbf), rtol=2e-2, atol=2e-2)

    # Ragged batch: non-divisor Bt -> cdiv grid with a masked last block.
    x5 = jax.random.normal(jax.random.PRNGKey(0), (5, C, H, W), dtype=jnp.float32)
    out5 = jax.block_until_ready(lwe_forward(x5, params, bt=2))
    ref5 = lwe_reference(x5, params)
    np.testing.assert_allclose(np.asarray(out5), np.asarray(ref5),
                               rtol=1e-4, atol=1e-4)

    print("KERNEL_OK")
</pallas_src>

<mosaic_0001>
module attributes {stable_mosaic.version = 11 : i64} {
  func.func @lwe_kernel(%arg0: i32, %arg1: memref<2x32x256xf32, #tpu.memory_space<vmem>>, %arg2: memref<32x1xf32, #tpu.memory_space<vmem>>, %arg3: memref<32x16xf32, #tpu.memory_space<vmem>>, %arg4: memref<16x32xf32, #tpu.memory_space<vmem>>, %arg5: memref<8x32xf32, #tpu.memory_space<vmem>>, %arg6: memref<2x32x256xf32, #tpu.memory_space<vmem>>) attributes {dimension_semantics = [#tpu.dimension_semantics<parallel>], iteration_bounds = array<i64: 1>, scalar_prefetch = 0 : i64, scratch_operands = 0 : i64, tpu.core_type = #tpu.core_type<tc>, window_params = [{transform_indices = @transform_0, window_bounds = array<i64: 2, 32, 256>}, {pipeline_mode = #tpu.pipeline_mode<synchronous>, transform_indices = @transform_1, window_bounds = array<i64: 32, 1>}, {pipeline_mode = #tpu.pipeline_mode<synchronous>, transform_indices = @transform_2, window_bounds = array<i64: 32, 16>}, {pipeline_mode = #tpu.pipeline_mode<synchronous>, transform_indices = @transform_3, window_bounds = array<i64: 16, 32>}, {pipeline_mode = #tpu.pipeline_mode<synchronous>, transform_indices = @transform_4, window_bounds = array<i64: 8, 32>}, {transform_indices = @transform_5, window_bounds = array<i64: 2, 32, 256>}]} {
    %c0 = arith.constant 0 : index
    %c0_0 = arith.constant 0 : index
    %c0_1 = arith.constant 0 : index
    %0 = vector.load %arg1[%c0, %c0_0, %c0_1] : memref<2x32x256xf32, #tpu.memory_space<vmem>>, vector<2x32x256xf32>
    %c0_2 = arith.constant 0 : index
    %c0_3 = arith.constant 0 : index
    %1 = vector.load %arg2[%c0_2, %c0_3] : memref<32x1xf32, #tpu.memory_space<vmem>>, vector<32x1xf32>
    %c0_4 = arith.constant 0 : index
    %c0_5 = arith.constant 0 : index
    %2 = vector.load %arg3[%c0_4, %c0_5] : memref<32x16xf32, #tpu.memory_space<vmem>>, vector<32x16xf32>
    %c0_6 = arith.constant 0 : index
    %c0_7 = arith.constant 0 : index
    %3 = vector.load %arg4[%c0_6, %c0_7] : memref<16x32xf32, #tpu.memory_space<vmem>>, vector<16x32xf32>
    %c0_8 = arith.constant 0 : index
    %c0_9 = arith.constant 0 : index
    %4 = vector.load %arg5[%c0_8, %c0_9] : memref<8x32xf32, #tpu.memory_space<vmem>>, vector<8x32xf32>
    %5 = vector.extract_strided_slice %4 {offsets = [0, 0], sizes = [1, 1], strides = [1, 1]} : vector<8x32xf32> to vector<1x1xf32>
    %6 = vector.shape_cast %1 : vector<32x1xf32> to vector<1x32x1xf32>
    %7 = vector.broadcast %6 : vector<1x32x1xf32> to vector<2x32x256xf32>
    %8 = arith.mulf %0, %7 : vector<2x32x256xf32>
    %cst = arith.constant dense<0.000000e+00> : vector<2x256xf32>
    %9 = vector.multi_reduction <add>, %8, %cst [1] : vector<2x32x256xf32> to vector<2x256xf32>
    %10 = vector.broadcast %5 : vector<1x1xf32> to vector<2x256xf32>
    %11 = arith.addf %9, %10 : vector<2x256xf32>
    %cst_10 = arith.constant dense<0xFF800000> : vector<2xf32>
    %12 = vector.multi_reduction <maximumf>, %11, %cst_10 [1] : vector<2x256xf32> to vector<2xf32>
    %13 = vector.shape_cast %12 : vector<2xf32> to vector<2x1xf32>
    %14 = vector.broadcast %13 : vector<2x1xf32> to vector<2x256xf32>
    %15 = arith.subf %11, %14 : vector<2x256xf32>
    %16 = math.exp %15 : vector<2x256xf32>
    %cst_11 = arith.constant dense<0.000000e+00> : vector<2xf32>
    %17 = vector.multi_reduction <add>, %16, %cst_11 [1] : vector<2x256xf32> to vector<2xf32>
    %18 = vector.shape_cast %17 : vector<2xf32> to vector<2x1xf32>
    %19 = vector.shape_cast %16 : vector<2x256xf32> to vector<2x1x256xf32>
    %20 = vector.broadcast %19 : vector<2x1x256xf32> to vector<2x32x256xf32>
    %21 = arith.mulf %0, %20 : vector<2x32x256xf32>
    %cst_12 = arith.constant dense<0.000000e+00> : vector<2x32xf32>
    %22 = vector.multi_reduction <add>, %21, %cst_12 [2] : vector<2x32x256xf32> to vector<2x32xf32>
    %23 = vector.broadcast %18 : vector<2x1xf32> to vector<2x32xf32>
    %24 = arith.divf %22, %23 : vector<2x32xf32>
    %25 = vector.extract_strided_slice %4 {offsets = [1, 0], sizes = [1, 16], strides = [1, 1]} : vector<8x32xf32> to vector<1x16xf32>
    %26 = vector.extract_strided_slice %4 {offsets = [2, 0], sizes = [1, 16], strides = [1, 1]} : vector<8x32xf32> to vector<1x16xf32>
    %27 = vector.extract_strided_slice %4 {offsets = [3, 0], sizes = [1, 16], strides = [1, 1]} : vector<8x32xf32> to vector<1x16xf32>
    %cst_13 = arith.constant dense<0.000000e+00> : vector<2x16xf32>
    %28 = tpu.matmul %24, %2, %cst_13 {dimension_numbers = #tpu.dot_dimension_numbers<[1], [0], [0], [1], [0, 0, 1, 1], [], []>, precision = #tpu.contract_precision<fp32>} : vector<2x32xf32>, vector<32x16xf32>, vector<2x16xf32> -> vector<2x16xf32>
    %29 = vector.broadcast %25 : vector<1x16xf32> to vector<2x16xf32>
    %30 = arith.addf %28, %29 : vector<2x16xf32>
    %31 = vector.extract_strided_slice %30 {offsets = [0, 0], sizes = [2, 8], strides = [1, 1]} : vector<2x16xf32> to vector<2x8xf32>
    %32 = vector.extract_strided_slice %26 {offsets = [0, 0], sizes = [1, 8], strides = [1, 1]} : vector<1x16xf32> to vector<1x8xf32>
    %33 = vector.extract_strided_slice %27 {offsets = [0, 0], sizes = [1, 8], strides = [1, 1]} : vector<1x16xf32> to vector<1x8xf32>
    %cst_14 = arith.constant dense<0.000000e+00> : vector<2xf32>
    %34 = vector.multi_reduction <add>, %31, %cst_14 [1] : vector<2x8xf32> to vector<2xf32>
    %35 = vector.shape_cast %34 : vector<2xf32> to vector<2x1xf32>
    %cst_15 = arith.constant 8.000000e+00 : f32
    %36 = vector.broadcast %cst_15 : f32 to vector<2x1xf32>
    %37 = arith.divf %35, %36 : vector<2x1xf32>
    %38 = vector.broadcast %37 : vector<2x1xf32> to vector<2x8xf32>
    %39 = arith.subf %31, %38 : vector<2x8xf32>
    %40 = arith.mulf %39, %39 : vector<2x8xf32>
    %cst_16 = arith.constant dense<0.000000e+00> : vector<2xf32>
    %41 = vector.multi_reduction <add>, %40, %cst_16 [1] : vector<2x8xf32> to vector<2xf32>
    %42 = vector.shape_cast %41 : vector<2xf32> to vector<2x1xf32>
    %cst_17 = arith.constant 8.000000e+00 : f32
    %43 = vector.broadcast %cst_17 : f32 to vector<2x1xf32>
    %44 = arith.divf %42, %43 : vector<2x1xf32>
    %45 = vector.broadcast %37 : vector<2x1xf32> to vector<2x8xf32>
    %46 = arith.subf %31, %45 : vector<2x8xf32>
    %cst_18 = arith.constant 9.99999974E-6 : f32
    %47 = vector.broadcast %cst_18 : f32 to vector<2x1xf32>
    %48 = arith.addf %44, %47 : vector<2x1xf32>
    %49 = math.rsqrt %48 : vector<2x1xf32>
    %50 = vector.broadcast %49 : vector<2x1xf32> to vector<2x8xf32>
    %51 = arith.mulf %46, %50 : vector<2x8xf32>
    %52 = vector.broadcast %32 : vector<1x8xf32> to vector<2x8xf32>
    %53 = arith.mulf %51, %52 : vector<2x8xf32>
    %54 = vector.broadcast %33 : vector<1x8xf32> to vector<2x8xf32>
    %55 = arith.addf %53, %54 : vector<2x8xf32>
    %cst_19 = arith.constant 0.000000e+00 : f32
    %56 = vector.broadcast %cst_19 : f32 to vector<2x8xf32>
    %57 = arith.maximumf %55, %56 : vector<2x8xf32>
    %58 = vector.extract_strided_slice %30 {offsets = [0, 8], sizes = [2, 8], strides = [1, 1]} : vector<2x16xf32> to vector<2x8xf32>
    %59 = vector.extract_strided_slice %26 {offsets = [0, 8], sizes = [1, 8], strides = [1, 1]} : vector<1x16xf32> to vector<1x8xf32>
    %60 = vector.extract_strided_slice %27 {offsets = [0, 8], sizes = [1, 8], strides = [1, 1]} : vector<1x16xf32> to vector<1x8xf32>
    %cst_20 = arith.constant dense<0.000000e+00> : vector<2xf32>
    %61 = vector.multi_reduction <add>, %58, %cst_20 [1] : vector<2x8xf32> to vector<2xf32>
    %62 = vector.shape_cast %61 : vector<2xf32> to vector<2x1xf32>
    %cst_21 = arith.constant 8.000000e+00 : f32
    %63 = vector.broadcast %cst_21 : f32 to vector<2x1xf32>
    %64 = arith.divf %62, %63 : vector<2x1xf32>
    %65 = vector.broadcast %64 : vector<2x1xf32> to vector<2x8xf32>
    %66 = arith.subf %58, %65 : vector<2x8xf32>
    %67 = arith.mulf %66, %66 : vector<2x8xf32>
    %cst_22 = arith.constant dense<0.000000e+00> : vector<2xf32>
    %68 = vector.multi_reduction <add>, %67, %cst_22 [1] : vector<2x8xf32> to vector<2xf32>
    %69 = vector.shape_cast %68 : vector<2xf32> to vector<2x1xf32>
    %cst_23 = arith.constant 8.000000e+00 : f32
    %70 = vector.broadcast %cst_23 : f32 to vector<2x1xf32>
    %71 = arith.divf %69, %70 : vector<2x1xf32>
    %72 = vector.broadcast %64 : vector<2x1xf32> to vector<2x8xf32>
    %73 = arith.subf %58, %72 : vector<2x8xf32>
    %cst_24 = arith.constant 9.99999974E-6 : f32
    %74 = vector.broadcast %cst_24 : f32 to vector<2x1xf32>
    %75 = arith.addf %71, %74 : vector<2x1xf32>
    %76 = math.rsqrt %75 : vector<2x1xf32>
    %77 = vector.broadcast %76 : vector<2x1xf32> to vector<2x8xf32>
    %78 = arith.mulf %73, %77 : vector<2x8xf32>
    %79 = vector.broadcast %59 : vector<1x8xf32> to vector<2x8xf32>
    %80 = arith.mulf %78, %79 : vector<2x8xf32>
    %81 = vector.broadcast %60 : vector<1x8xf32> to vector<2x8xf32>
    %82 = arith.addf %80, %81 : vector<2x8xf32>
    %cst_25 = arith.constant 0.000000e+00 : f32
    %83 = vector.broadcast %cst_25 : f32 to vector<2x8xf32>
    %84 = arith.maximumf %82, %83 : vector<2x8xf32>
    %85 = vector.extract_strided_slice %4 {offsets = [4, 0], sizes = [1, 32], strides = [1, 1]} : vector<8x32xf32> to vector<1x32xf32>
    %86 = vector.extract_strided_slice %4 {offsets = [5, 0], sizes = [1, 32], strides = [1, 1]} : vector<8x32xf32> to vector<1x32xf32>
    %87 = vector.extract_strided_slice %3 {offsets = [0, 0], sizes = [8, 32], strides = [1, 1]} : vector<16x32xf32> to vector<8x32xf32>
    %cst_26 = arith.constant dense<0.000000e+00> : vector<2x32xf32>
    %88 = tpu.matmul %57, %87, %cst_26 {dimension_numbers = #tpu.dot_dimension_numbers<[1], [0], [0], [1], [0, 0, 1, 1], [], []>, precision = #tpu.contract_precision<fp32>} : vector<2x8xf32>, vector<8x32xf32>, vector<2x32xf32> -> vector<2x32xf32>
    %89 = vector.broadcast %85 : vector<1x32xf32> to vector<2x32xf32>
    %90 = arith.addf %88, %89 : vector<2x32xf32>
    %91 = vector.extract_strided_slice %3 {offsets = [8, 0], sizes = [8, 32], strides = [1, 1]} : vector<16x32xf32> to vector<8x32xf32>
    %cst_27 = arith.constant dense<0.000000e+00> : vector<2x32xf32>
    %92 = tpu.matmul %84, %91, %cst_27 {dimension_numbers = #tpu.dot_dimension_numbers<[1], [0], [0], [1], [0, 0, 1, 1], [], []>, precision = #tpu.contract_precision<fp32>} : vector<2x8xf32>, vector<8x32xf32>, vector<2x32xf32> -> vector<2x32xf32>
    %93 = vector.broadcast %86 : vector<1x32xf32> to vector<2x32xf32>
    %94 = arith.addf %92, %93 : vector<2x32xf32>
    %95 = arith.negf %94 : vector<2x32xf32>
    %96 = math.exp %95 : vector<2x32xf32>
    %cst_28 = arith.constant 1.000000e+00 : f32
    %97 = vector.broadcast %cst_28 : f32 to vector<2x32xf32>
    %98 = arith.addf %97, %96 : vector<2x32xf32>
    %99 = arith.divf %97, %98 : vector<2x32xf32>
    %100 = vector.shape_cast %99 : vector<2x32xf32> to vector<2x32x1xf32>
    %101 = vector.broadcast %100 : vector<2x32x1xf32> to vector<2x32x256xf32>
    %102 = arith.mulf %0, %101 : vector<2x32x256xf32>
    %103 = vector.shape_cast %90 : vector<2x32xf32> to vector<2x32x1xf32>
    %104 = vector.broadcast %103 : vector<2x32x1xf32> to vector<2x32x256xf32>
    %105 = arith.addf %102, %104 : vector<2x32x256xf32>
    %c0_29 = arith.constant 0 : index
    %c0_30 = arith.constant 0 : index
    %c0_31 = arith.constant 0 : index
    %106 = vector.load %arg6[%c0_29, %c0_30, %c0_31] : memref<2x32x256xf32, #tpu.memory_space<vmem>>, vector<2x32x256xf32>
    tpu.vector_store %arg6[%c0_29, %c0_30, %c0_31], %105 {strides = array<i32>} : memref<2x32x256xf32, #tpu.memory_space<vmem>>, vector<2x32x256xf32>,
    return
  }
  func.func @transform_0(%arg0: i32) -> (i32, i32, i32) {
    %c0_i32 = arith.constant 0 : i32
    %c0_i32_0 = arith.constant 0 : i32
    %c0_i32_1 = arith.constant 0 : i32
    return %arg0, %c0_i32, %c0_i32_0 : i32, i32, i32
  }
  func.func @transform_1(%arg0: i32) -> (i32, i32) {
    %c0_i32 = arith.constant 0 : i32
    %c0_i32_0 = arith.constant 0 : i32
    %c0_i32_1 = arith.constant 0 : i32
    return %c0_i32, %c0_i32_0 : i32, i32
  }
  func.func @transform_2(%arg0: i32) -> (i32, i32) {
    %c0_i32 = arith.constant 0 : i32
    %c0_i32_0 = arith.constant 0 : i32
    %c0_i32_1 = arith.constant 0 : i32
    return %c0_i32, %c0_i32_0 : i32, i32
  }
  func.func @transform_3(%arg0: i32) -> (i32, i32) {
    %c0_i32 = arith.constant 0 : i32
    %c0_i32_0 = arith.constant 0 : i32
    %c0_i32_1 = arith.constant 0 : i32
    return %c0_i32, %c0_i32_0 : i32, i32
  }
  func.func @transform_4(%arg0: i32) -> (i32, i32) {
    %c0_i32 = arith.constant 0 : i32
    %c0_i32_0 = arith.constant 0 : i32
    %c0_i32_1 = arith.constant 0 : i32
    return %c0_i32, %c0_i32_0 : i32, i32
  }
  func.func @transform_5(%arg0: i32) -> (i32, i32, i32) {
    %c0_i32 = arith.constant 0 : i32
    %c0_i32_0 = arith.constant 0 : i32
    %c0_i32_1 = arith.constant 0 : i32
    return %arg0, %c0_i32, %c0_i32_0 : i32, i32, i32
  }
}

module attributes {stable_mosaic.version = 11 : i64} {
  func.func @lwe_kernel(%arg0: i32, %arg1: memref<2x32x256xf32, #tpu.memory_space<vmem>>, %arg2: memref<32x1xf32, #tpu.memory_space<vmem>>, %arg3: memref<32x16xf32, #tpu.memory_space<vmem>>, %arg4: memref<16x32xf32, #tpu.memory_space<vmem>>, %arg5: memref<8x32xf32, #tpu.memory_space<vmem>>, %arg6: memref<2x32x256xf32, #tpu.memory_space<vmem>>) attributes {dimension_semantics = [#tpu.dimension_semantics<parallel>], iteration_bounds = array<i64: 1>, scalar_prefetch = 0 : i64, scratch_operands = 0 : i64, tpu.core_type = #tpu.core_type<tc>, window_params = [{transform_indices = @transform_0, window_bounds = array<i64: 2, 32, 256>}, {pipeline_mode = #tpu.pipeline_mode<synchronous>, transform_indices = @transform_1, window_bounds = array<i64: 32, 1>}, {pipeline_mode = #tpu.pipeline_mode<synchronous>, transform_indices = @transform_2, window_bounds = array<i64: 32, 16>}, {pipeline_mode = #tpu.pipeline_mode<synchronous>, transform_indices = @transform_3, window_bounds = array<i64: 16, 32>}, {pipeline_mode = #tpu.pipeline_mode<synchronous>, transform_indices = @transform_4, window_bounds = array<i64: 8, 32>}, {transform_indices = @transform_5, window_bounds = array<i64: 2, 32, 256>}]} {
    %c0 = arith.constant 0 : index
    %c0_0 = arith.constant 0 : index
    %c0_1 = arith.constant 0 : index
    %0 = vector.load %arg1[%c0, %c0_0, %c0_1] : memref<2x32x256xf32, #tpu.memory_space<vmem>>, vector<2x32x256xf32>
    %c0_2 = arith.constant 0 : index
    %c0_3 = arith.constant 0 : index
    %1 = vector.load %arg2[%c0_2, %c0_3] : memref<32x1xf32, #tpu.memory_space<vmem>>, vector<32x1xf32>
    %c0_4 = arith.constant 0 : index
    %c0_5 = arith.constant 0 : index
    %2 = vector.load %arg3[%c0_4, %c0_5] : memref<32x16xf32, #tpu.memory_space<vmem>>, vector<32x16xf32>
    %c0_6 = arith.constant 0 : index
    %c0_7 = arith.constant 0 : index
    %3 = vector.load %arg4[%c0_6, %c0_7] : memref<16x32xf32, #tpu.memory_space<vmem>>, vector<16x32xf32>
    %c0_8 = arith.constant 0 : index
    %c0_9 = arith.constant 0 : index
    %4 = vector.load %arg5[%c0_8, %c0_9] : memref<8x32xf32, #tpu.memory_space<vmem>>, vector<8x32xf32>
    %5 = vector.extract_strided_slice %4 {offsets = [0, 0], sizes = [1, 1], strides = [1, 1]} : vector<8x32xf32> to vector<1x1xf32>
    %6 = vector.shape_cast %1 : vector<32x1xf32> to vector<1x32x1xf32>
    %7 = vector.broadcast %6 : vector<1x32x1xf32> to vector<2x32x256xf32>
    %8 = arith.mulf %0, %7 : vector<2x32x256xf32>
    %cst = arith.constant dense<0.000000e+00> : vector<2x256xf32>
    %9 = vector.multi_reduction <add>, %8, %cst [1] : vector<2x32x256xf32> to vector<2x256xf32>
    %10 = vector.broadcast %5 : vector<1x1xf32> to vector<2x256xf32>
    %11 = arith.addf %9, %10 : vector<2x256xf32>
    %cst_10 = arith.constant dense<0xFF800000> : vector<2xf32>
    %12 = vector.multi_reduction <maximumf>, %11, %cst_10 [1] : vector<2x256xf32> to vector<2xf32>
    %13 = vector.shape_cast %12 : vector<2xf32> to vector<2x1xf32>
    %14 = vector.broadcast %13 : vector<2x1xf32> to vector<2x256xf32>
    %15 = arith.subf %11, %14 : vector<2x256xf32>
    %16 = math.exp %15 : vector<2x256xf32>
    %cst_11 = arith.constant dense<0.000000e+00> : vector<2xf32>
    %17 = vector.multi_reduction <add>, %16, %cst_11 [1] : vector<2x256xf32> to vector<2xf32>
    %18 = vector.shape_cast %17 : vector<2xf32> to vector<2x1xf32>
    %19 = vector.shape_cast %16 : vector<2x256xf32> to vector<2x1x256xf32>
    %20 = vector.broadcast %19 : vector<2x1x256xf32> to vector<2x32x256xf32>
    %21 = arith.mulf %0, %20 : vector<2x32x256xf32>
    %cst_12 = arith.constant dense<0.000000e+00> : vector<2x32xf32>
    %22 = vector.multi_reduction <add>, %21, %cst_12 [2] : vector<2x32x256xf32> to vector<2x32xf32>
    %23 = vector.broadcast %18 : vector<2x1xf32> to vector<2x32xf32>
    %24 = arith.divf %22, %23 : vector<2x32xf32>
    %25 = vector.extract_strided_slice %4 {offsets = [1, 0], sizes = [1, 16], strides = [1, 1]} : vector<8x32xf32> to vector<1x16xf32>
    %26 = vector.extract_strided_slice %4 {offsets = [2, 0], sizes = [1, 16], strides = [1, 1]} : vector<8x32xf32> to vector<1x16xf32>
    %27 = vector.extract_strided_slice %4 {offsets = [3, 0], sizes = [1, 16], strides = [1, 1]} : vector<8x32xf32> to vector<1x16xf32>
    %cst_13 = arith.constant dense<0.000000e+00> : vector<2x16xf32>
    %28 = tpu.matmul %24, %2, %cst_13 {dimension_numbers = #tpu.dot_dimension_numbers<[1], [0], [0], [1], [0, 0, 1, 1], [], []>, precision = #tpu.contract_precision<fp32>} : vector<2x32xf32>, vector<32x16xf32>, vector<2x16xf32> -> vector<2x16xf32>
    %29 = vector.broadcast %25 : vector<1x16xf32> to vector<2x16xf32>
    %30 = arith.addf %28, %29 : vector<2x16xf32>
    %31 = vector.extract_strided_slice %30 {offsets = [0, 0], sizes = [2, 8], strides = [1, 1]} : vector<2x16xf32> to vector<2x8xf32>
    %32 = vector.extract_strided_slice %26 {offsets = [0, 0], sizes = [1, 8], strides = [1, 1]} : vector<1x16xf32> to vector<1x8xf32>
    %33 = vector.extract_strided_slice %27 {offsets = [0, 0], sizes = [1, 8], strides = [1, 1]} : vector<1x16xf32> to vector<1x8xf32>
    %cst_14 = arith.constant dense<0.000000e+00> : vector<2xf32>
    %34 = vector.multi_reduction <add>, %31, %cst_14 [1] : vector<2x8xf32> to vector<2xf32>
    %35 = vector.shape_cast %34 : vector<2xf32> to vector<2x1xf32>
    %cst_15 = arith.constant 8.000000e+00 : f32
    %36 = vector.broadcast %cst_15 : f32 to vector<2x1xf32>
    %37 = arith.divf %35, %36 : vector<2x1xf32>
    %38 = vector.broadcast %37 : vector<2x1xf32> to vector<2x8xf32>
    %39 = arith.subf %31, %38 : vector<2x8xf32>
    %40 = arith.mulf %39, %39 : vector<2x8xf32>
    %cst_16 = arith.constant dense<0.000000e+00> : vector<2xf32>
    %41 = vector.multi_reduction <add>, %40, %cst_16 [1] : vector<2x8xf32> to vector<2xf32>
    %42 = vector.shape_cast %41 : vector<2xf32> to vector<2x1xf32>
    %cst_17 = arith.constant 8.000000e+00 : f32
    %43 = vector.broadcast %cst_17 : f32 to vector<2x1xf32>
    %44 = arith.divf %42, %43 : vector<2x1xf32>
    %45 = vector.broadcast %37 : vector<2x1xf32> to vector<2x8xf32>
    %46 = arith.subf %31, %45 : vector<2x8xf32>
    %cst_18 = arith.constant 9.99999974E-6 : f32
    %47 = vector.broadcast %cst_18 : f32 to vector<2x1xf32>
    %48 = arith.addf %44, %47 : vector<2x1xf32>
    %49 = math.rsqrt %48 : vector<2x1xf32>
    %50 = vector.broadcast %49 : vector<2x1xf32> to vector<2x8xf32>
    %51 = arith.mulf %46, %50 : vector<2x8xf32>
    %52 = vector.broadcast %32 : vector<1x8xf32> to vector<2x8xf32>
    %53 = arith.mulf %51, %52 : vector<2x8xf32>
    %54 = vector.broadcast %33 : vector<1x8xf32> to vector<2x8xf32>
    %55 = arith.addf %53, %54 : vector<2x8xf32>
    %cst_19 = arith.constant 0.000000e+00 : f32
    %56 = vector.broadcast %cst_19 : f32 to vector<2x8xf32>
    %57 = arith.maximumf %55, %56 : vector<2x8xf32>
    %58 = vector.extract_strided_slice %30 {offsets = [0, 8], sizes = [2, 8], strides = [1, 1]} : vector<2x16xf32> to vector<2x8xf32>
    %59 = vector.extract_strided_slice %26 {offsets = [0, 8], sizes = [1, 8], strides = [1, 1]} : vector<1x16xf32> to vector<1x8xf32>
    %60 = vector.extract_strided_slice %27 {offsets = [0, 8], sizes = [1, 8], strides = [1, 1]} : vector<1x16xf32> to vector<1x8xf32>
    %cst_20 = arith.constant dense<0.000000e+00> : vector<2xf32>
    %61 = vector.multi_reduction <add>, %58, %cst_20 [1] : vector<2x8xf32> to vector<2xf32>
    %62 = vector.shape_cast %61 : vector<2xf32> to vector<2x1xf32>
    %cst_21 = arith.constant 8.000000e+00 : f32
    %63 = vector.broadcast %cst_21 : f32 to vector<2x1xf32>
    %64 = arith.divf %62, %63 : vector<2x1xf32>
    %65 = vector.broadcast %64 : vector<2x1xf32> to vector<2x8xf32>
    %66 = arith.subf %58, %65 : vector<2x8xf32>
    %67 = arith.mulf %66, %66 : vector<2x8xf32>
    %cst_22 = arith.constant dense<0.000000e+00> : vector<2xf32>
    %68 = vector.multi_reduction <add>, %67, %cst_22 [1] : vector<2x8xf32> to vector<2xf32>
    %69 = vector.shape_cast %68 : vector<2xf32> to vector<2x1xf32>
    %cst_23 = arith.constant 8.000000e+00 : f32
    %70 = vector.broadcast %cst_23 : f32 to vector<2x1xf32>
    %71 = arith.divf %69, %70 : vector<2x1xf32>
    %72 = vector.broadcast %64 : vector<2x1xf32> to vector<2x8xf32>
    %73 = arith.subf %58, %72 : vector<2x8xf32>
    %cst_24 = arith.constant 9.99999974E-6 : f32
    %74 = vector.broadcast %cst_24 : f32 to vector<2x1xf32>
    %75 = arith.addf %71, %74 : vector<2x1xf32>
    %76 = math.rsqrt %75 : vector<2x1xf32>
    %77 = vector.broadcast %76 : vector<2x1xf32> to vector<2x8xf32>
    %78 = arith.mulf %73, %77 : vector<2x8xf32>
    %79 = vector.broadcast %59 : vector<1x8xf32> to vector<2x8xf32>
    %80 = arith.mulf %78, %79 : vector<2x8xf32>
    %81 = vector.broadcast %60 : vector<1x8xf32> to vector<2x8xf32>
    %82 = arith.addf %80, %81 : vector<2x8xf32>
    %cst_25 = arith.constant 0.000000e+00 : f32
    %83 = vector.broadcast %cst_25 : f32 to vector<2x8xf32>
    %84 = arith.maximumf %82, %83 : vector<2x8xf32>
    %85 = vector.extract_strided_slice %4 {offsets = [4, 0], sizes = [1, 32], strides = [1, 1]} : vector<8x32xf32> to vector<1x32xf32>
    %86 = vector.extract_strided_slice %4 {offsets = [5, 0], sizes = [1, 32], strides = [1, 1]} : vector<8x32xf32> to vector<1x32xf32>
    %87 = vector.extract_strided_slice %3 {offsets = [0, 0], sizes = [8, 32], strides = [1, 1]} : vector<16x32xf32> to vector<8x32xf32>
    %cst_26 = arith.constant dense<0.000000e+00> : vector<2x32xf32>
    %88 = tpu.matmul %57, %87, %cst_26 {dimension_numbers = #tpu.dot_dimension_numbers<[1], [0], [0], [1], [0, 0, 1, 1], [], []>, precision = #tpu.contract_precision<fp32>} : vector<2x8xf32>, vector<8x32xf32>, vector<2x32xf32> -> vector<2x32xf32>
    %89 = vector.broadcast %85 : vector<1x32xf32> to vector<2x32xf32>
    %90 = arith.addf %88, %89 : vector<2x32xf32>
    %91 = vector.extract_strided_slice %3 {offsets = [8, 0], sizes = [8, 32], strides = [1, 1]} : vector<16x32xf32> to vector<8x32xf32>
    %cst_27 = arith.constant dense<0.000000e+00> : vector<2x32xf32>
    %92 = tpu.matmul %84, %91, %cst_27 {dimension_numbers = #tpu.dot_dimension_numbers<[1], [0], [0], [1], [0, 0, 1, 1], [], []>, precision = #tpu.contract_precision<fp32>} : vector<2x8xf32>, vector<8x32xf32>, vector<2x32xf32> -> vector<2x32xf32>
    %93 = vector.broadcast %86 : vector<1x32xf32> to vector<2x32xf32>
    %94 = arith.addf %92, %93 : vector<2x32xf32>
    %95 = arith.negf %94 : vector<2x32xf32>
    %96 = math.exp %95 : vector<2x32xf32>
    %cst_28 = arith.constant 1.000000e+00 : f32
    %97 = vector.broadcast %cst_28 : f32 to vector<2x32xf32>
    %98 = arith.addf %97, %96 : vector<2x32xf32>
    %99 = arith.divf %97, %98 : vector<2x32xf32>
    %100 = vector.shape_cast %99 : vector<2x32xf32> to vector<2x32x1xf32>
    %101 = vector.broadcast %100 : vector<2x32x1xf32> to vector<2x32x256xf32>
    %102 = arith.mulf %0, %101 : vector<2x32x256xf32>
    %103 = vector.shape_cast %90 : vector<2x32xf32> to vector<2x32x1xf32>
    %104 = vector.broadcast %103 : vector<2x32x1xf32> to vector<2x32x256xf32>
    %105 = arith.addf %102, %104 : vector<2x32x256xf32>
    %c0_29 = arith.constant 0 : index
    %c0_30 = arith.constant 0 : index
    %c0_31 = arith.constant 0 : index
    %106 = vector.load %arg6[%c0_29, %c0_30, %c0_31] : memref<2x32x256xf32, #tpu.memory_space<vmem>>, vector<2x32x256xf32>
    tpu.vector_store %arg6[%c0_29, %c0_30, %c0_31], %105 {strides = array<i32>} : memref<2x32x256xf32, #tpu.memory_space<vmem>>, vector<2x32x256xf32>,
    return
  }
  func.func @transform_0(%arg0: i32) -> (i32, i32, i32) {
    %c0_i32 = arith.constant 0 : i32
    %c0_i32_0 = arith.constant 0 : i32
    %c0_i32_1 = arith.constant 0 : i32
    return %arg0, %c0_i32, %c0_i32_0 : i32, i32, i32
  }
  func.func @transform_1(%arg0: i32) -> (i32, i32) {
    %c0_i32 = arith.constant 0 : i32
    %c0_i32_0 = arith.constant 0 : i32
    %c0_i32_1 = arith.constant 0 : i32
    return %c0_i32, %c0_i32_0 : i32, i32
  }
  func.func @transform_2(%arg0: i32) -> (i32, i32) {
    %c0_i32 = arith.constant 0 : i32
    %c0_i32_0 = arith.constant 0 : i32
    %c0_i32_1 = arith.constant 0 : i32
    return %c0_i32, %c0_i32_0 : i32, i32
  }
  func.func @transform_3(%arg0: i32) -> (i32, i32) {
    %c0_i32 = arith.constant 0 : i32
    %c0_i32_0 = arith.constant 0 : i32
    %c0_i32_1 = arith.constant 0 : i32
    return %c0_i32, %c0_i32_0 : i32, i32
  }
  func.func @transform_4(%arg0: i32) -> (i32, i32) {
    %c0_i32 = arith.constant 0 : i32
    %c0_i32_0 = arith.constant 0 : i32
    %c0_i32_1 = arith.constant 0 : i32
    return %c0_i32, %c0_i32_0 : i32, i32
  }
  func.func @transform_5(%arg0: i32) -> (i32, i32, i32) {
    %c0_i32 = arith.constant 0 : i32
    %c0_i32_0 = arith.constant 0 : i32
    %c0_i32_1 = arith.constant 0 : i32
    return %arg0, %c0_i32, %c0_i32_0 : i32, i32, i32
  }
}

</mosaic_0001>

<bundles_post_ra>
// kernel: tpu_custom_call.1
= control target key start
LH: loop header
LB: loop body
LE: loop exit
PB: predicated region body
PF: predicated region fallthrough
CT: control target
= control target key end

     0   :  { %10 = vsyncpa [#allocation3], 0  ;;  %s1409_s0 = inlined_call_operand.hbm [shape: f32[2,32,256], index: 0, kind: input, shape index: {}]   ;;  %s1410_s1 = inlined_call_operand.vmem [shape: f32[32,1], index: 1, kind: input, shape index: {}]   ;;  %s1411_s2 = inlined_call_operand.vmem [shape: f32[32,16], index: 2, kind: input, shape index: {}]   ;;  %s1412_s3 = inlined_call_operand.vmem [shape: f32[16,32], index: 3, kind: input, shape index: {}]   ;;  %s1413_s4 = inlined_call_operand.vmem [shape: f32[8,32], index: 4, kind: input, shape index: {}]   ;;  %s1414_s5 = inlined_call_operand.hbm [shape: f32[2,32,256], index: 5, kind: output, shape index: {}]  }
   0x1   :  { %11 = vsyncpa [#allocation4], 0  ;;  %s16_s20 = sshll.u32 %s1409_s0, 4  ;;  %s1190_s21 = smov [#allocation2]   ;;  %s17_s20 = int_to_ptr.hbm [resolvable:$true] %s16_s20 }
   0x2   :  { %s18_s22 = sshll.u32 %s1190_s21, 4  ;;  %s1191_s23 = smov 256   ;;  %s19_s22 = int_to_ptr.vmem [resolvable:$true] %s18_s22 }
   0x3   :  { %s1192_s24 = smov 16  }
   0x4   :  { %24 = dma.hbm_to_vmem [thread:$0]  %s17_s20, 2048, %s19_s22, [#allocation3], %s1191_s23, %s1191_s23, %s1192_s24  }
   0x5   :  { %1186 = dma.done.wait [#allocation3], 2048  }
   0x6   :  { %1187 = vsyncadd [#allocation3], 4294965248  ;;  %v1193_v0 = vmov 0   ;;  %v55_v1 = vld [vmem:[%s1410_s1 + $0x10] sm:$0xff]  ;;  %v53_v2 = vld [vmem:[%s1410_s1] sm:$0xff]  ;;  %vm148_vm0 = vcmask 1041409  }
   0x7   :  { %1087 = vset.pattern.permute.xlu1 %v1193_v0  ;;  %1086 = vset.pattern.permute.xlu0 %v1193_v0  ;;  %v1242_v3 = vld [vmem:[%s1413_s4] sm:$0xff]  ;;  %v56_v4 = vld [vmem:[%s1410_s1 + $0x18] sm:$0xff]  ;;  %v54_v5 = vld [vmem:[%s1410_s1 + $0x8] sm:$0xff]  ;;  %vm153_vm1 = vcmask 1041408   ;;  %vm313_vm10 = vcmask 130112   ;;  %vm317_vm11 = vcmask 195712  }
   0x8   :  { %1088 = vset.pattern.permute.xlu2 %v1193_v0  ;;  %76 = vperm.xlu1 %1087, %v55_v1   ;;  %1077 = vpush %v1242_v3  ;;  %v1251_v8 = vld [vmem:[#allocation2] sm:$0xff]  ;;  %v1253_v9 = vld [vmem:[#allocation2 + $0x8] sm:$0xff]  ;;  %v1261_v13 = vld [vmem:[#allocation2 + $0x10] sm:$0xff]  ;;  %vm321_vm12 = vcmask 261312   ;;  %vm331_vm13 = vcmask 261120   ;;  %vm519_vm14 = vcmask 58368  }
   0x9   :  { %66 = vperm.xlu0 %1086, %v53_v2   ;;  %v1255_v10 = vld [vmem:[#allocation2 + $0x20] sm:$0xff]  ;;  %v1259_v12 = vld [vmem:[#allocation2 + $0x48] sm:$0xff]  ;;  %v1263_v14 = vld [vmem:[#allocation2 + $0x18] sm:$0xff]  ;;  %s1063_s25 = sshll.u32 %s1414_s5, 4  ;;  %s1064_s25 = int_to_ptr.hbm [resolvable:$true] %s1063_s25 }
   0xa   :  { %v1257_v11 = vld [vmem:[#allocation2 + $0x40] sm:$0xff]  ;;  %v1265_v15 = vld [vmem:[#allocation2 + $0x50] sm:$0xff]  ;;  %v1267_v16 = vld [vmem:[#allocation2 + $0x58] sm:$0xff] }
   0xb   :  { %v1269_v17 = vld [vmem:[#allocation2 + $0x28] sm:$0xff]  ;;  %v1271_v18 = vld [vmem:[#allocation2 + $0x60] sm:$0xff]  ;;  %v1279_v25 = vld [vmem:[#allocation2 + $0x30] sm:$0xff] }
   0xc   :  { %v1273_v19 = vld [vmem:[#allocation2 + $0x68] sm:$0xff]  ;;  %v1281_v27 = vld [vmem:[#allocation2 + $0x38] sm:$0xff]  ;;  %v1283_v28 = vld [vmem:[#allocation2 + $0x70] sm:$0xff] }
   0xd   :  { %v1285_v29 = vld [vmem:[#allocation2 + $0x78] sm:$0xff] }
  0x10   :  { %81 = vperm.xlu1 %1087, %v56_v4  }
  0x11   :  { %71 = vperm.xlu0 %1086, %v54_v5  }
  0x39   :  { %s1078_s1 = spop %1077 }
  0x7a   :  { %v77_v6 = vpop.permute.xlu1 %76 }
  0x7b   :  { %v67_v7 = vpop.permute.xlu0 %66  ;;  %v88_v34 = vmul.f32 %v77_v6, %v1255_v10  ;;  %v89_v35 = vmul.f32 %v77_v6, %v1269_v17  ;;  %v96_v36 = vmul.f32 %v77_v6, %v1271_v18  ;;  %v97_v37 = vmul.f32 %v77_v6, %v1273_v19 }
  0x7c   :  { %v84_v21 = vmul.f32 %v67_v7, %v1251_v8  ;;  %v85_v22 = vmul.f32 %v67_v7, %v1253_v9  ;;  %v92_v23 = vmul.f32 %v67_v7, %v1257_v11  ;;  %v93_v24 = vmul.f32 %v67_v7, %v1259_v12 }
  0x82   :  { %v82_v26 = vpop.permute.xlu1 %81 }
  0x83   :  { %v72_v20 = vpop.permute.xlu0 %71  ;;  %v90_v42 = vmul.f32 %v82_v26, %v1279_v25  ;;  %v91_v43 = vmul.f32 %v82_v26, %v1281_v27  ;;  %v98_v44 = vmul.f32 %v82_v26, %v1283_v28  ;;  %v99_v45 = vmul.f32 %v82_v26, %v1285_v29 }
  0x84   :  { %v86_v30 = vmul.f32 %v72_v20, %v1261_v13  ;;  %v87_v31 = vmul.f32 %v72_v20, %v1263_v14  ;;  %v94_v32 = vmul.f32 %v72_v20, %v1265_v15  ;;  %v95_v33 = vmul.f32 %v72_v20, %v1267_v16 }
  0x86   :  { %v100_v38 = vadd.f32 %v86_v30, %v84_v21  ;;  %v109_v39 = vadd.f32 %v87_v31, %v85_v22  ;;  %v118_v40 = vadd.f32 %v94_v32, %v92_v23  ;;  %v127_v41 = vadd.f32 %v95_v33, %v93_v24 }
  0x87   :  { %v138_v23 = vstv %s1078_s1 }
  0x88   :  { %v101_v46 = vadd.f32 %v100_v38, %v88_v34  ;;  %v110_v47 = vadd.f32 %v109_v39, %v89_v35  ;;  %v119_v48 = vadd.f32 %v118_v40, %v96_v36  ;;  %v128_v49 = vadd.f32 %v127_v41, %v97_v37 }
  0x8a   :  { %v102_v50 = vadd.f32 %v101_v46, %v90_v42  ;;  %v111_v51 = vadd.f32 %v110_v47, %v91_v43  ;;  %v120_v52 = vadd.f32 %v119_v48, %v98_v44  ;;  %v129_v53 = vadd.f32 %v128_v49, %v99_v45 }
  0x8c   :  { %v103_v54 = vrot.slane %v102_v50, 4  ;;  %v112_v55 = vrot.slane %v111_v51, 4  ;;  %v121_v56 = vrot.slane %v120_v52, 4  ;;  %v130_v57 = vrot.slane %v129_v53, 4 }
  0x8e   :  { %v104_v58 = vadd.f32 %v103_v54, %v102_v50  ;;  %v113_v59 = vadd.f32 %v112_v55, %v111_v51  ;;  %v122_v60 = vadd.f32 %v121_v56, %v120_v52  ;;  %v131_v61 = vadd.f32 %v130_v57, %v129_v53 }
  0x90   :  { %v105_v62 = vrot.slane %v104_v58, 2  ;;  %v114_v63 = vrot.slane %v113_v59, 2  ;;  %v123_v0 = vrot.slane %v122_v60, 2  ;;  %v132_v1 = vrot.slane %v131_v61, 2 }
  0x92   :  { %v106_v2 = vadd.f32 %v105_v62, %v104_v58  ;;  %v115_v4 = vadd.f32 %v114_v63, %v113_v59  ;;  %v124_v5 = vadd.f32 %v123_v0, %v122_v60  ;;  %v133_v6 = vadd.f32 %v132_v1, %v131_v61 }
  0x94   :  { %v107_v7 = vrot.slane %v106_v2, 1  ;;  %v116_v20 = vrot.slane %v115_v4, 1  ;;  %v125_v21 = vrot.slane %v124_v5, 1  ;;  %v134_v22 = vrot.slane %v133_v6, 1 }
  0x96   :  { %v108_v24 = vadd.f32 %v107_v7, %v106_v2  ;;  %v117_v26 = vadd.f32 %v116_v20, %v115_v4  ;;  %v126_v30 = vadd.f32 %v125_v21, %v124_v5  ;;  %v135_v31 = vadd.f32 %v134_v22, %v133_v6 }
  0x98   :  { %v140_v32 = vadd.f32 %v138_v23, %v108_v24  ;;  %v141_v33 = vadd.f32 %v138_v23, %v117_v26  ;;  %v142_v34 = vadd.f32 %v138_v23, %v126_v30  ;;  %v143_v35 = vadd.f32 %v138_v23, %v135_v31 }
  0x9a   :  { %v149_v36 = vsel %vm148_vm0, %v142_v34, %v140_v32  ;;  %v150_v37 = vsel %vm148_vm0, %v143_v35, %v141_v33 }
  0x9b   :  { %v154_v38 = vsel %vm153_vm1, %v149_v36, -inf  ;;  %v155_v39 = vsel %vm153_vm1, %v150_v37, -inf }
  0x9c   :  { %v156_v40 = vmax.f32 %v154_v38, %v155_v39 }
  0x9e   :  { %157 = vmax.xlane.f32.xlu2 %v156_v40 }
 0x111   :  { %v158_v41 = vpop.xlane.xlu2 %157 }
 0x112   :  { %v160_v42 = vrot.slane %v158_v41, 1  ;;  %v163_v43 = vsub.f32 %v140_v32, %v158_v41  ;;  %v164_v44 = vsub.f32 %v141_v33, %v158_v41 }
 0x114   :  { %v167_v45 = vmul.f32 1.442695, %v163_v43  ;;  %v169_v46 = vmul.f32 1.442695, %v164_v44  ;;  %v165_v47 = vsub.f32 %v142_v34, %v160_v42  ;;  %v166_v48 = vsub.f32 %v143_v35, %v160_v42 }
 0x116   :  { %1102 = vpow2.f32 %v167_v45  ;;  %v171_v49 = vmul.f32 1.442695, %v165_v47  ;;  %v173_v50 = vmul.f32 1.442695, %v166_v48 }
 0x117   :  { %1104 = vpow2.f32 %v169_v46 }
 0x118   :  { %1106 = vpow2.f32 %v171_v49 }
 0x119   :  { %1108 = vpow2.f32 %v173_v50 }
 0x11c   :  { %v1103_v51 = vpop.eup %1102 }
 0x11d   :  { %v1105_v52 = vpop.eup %1104  ;;  %v190_v53 = vperm.slane %v1103_v51, 0 }
 0x11e   :  { %v191_v54 = vperm.slane %v1105_v52, 0  ;;  %v1107_v0 = vpop.eup %1106 }
 0x11f   :  { %v198_v55 = vmul.f32 %v190_v53, %v1255_v10  ;;  %v196_v56 = vmul.f32 %v190_v53, %v1261_v13  ;;  %v194_v57 = vmul.f32 %v190_v53, %v1251_v8  ;;  %v1109_v1 = vpop.eup %1108  ;;  %v200_v10 = vmul.f32 %v190_v53, %v1279_v25 }
 0x120   :  { %v199_v58 = vmul.f32 %v191_v54, %v1269_v17  ;;  %v197_v59 = vmul.f32 %v191_v54, %v1263_v14  ;;  %v195_v60 = vmul.f32 %v191_v54, %v1253_v9  ;;  %v201_v13 = vmul.f32 %v191_v54, %v1281_v27 }
 0x121   :  { %v179_v2 = vrot.slane %v1107_v0, 7  ;;  %v181_v8 = vrot.slane %v1109_v1, 7  ;;  %v192_v7 = vperm.slane %v1107_v0, 0  ;;  %v193_v20 = vperm.slane %v1109_v1, 0 }
 0x122   :  { %v216_v61 = vadd.f32 %v199_v58, %v198_v55  ;;  %v213_v62 = vadd.f32 %v197_v59, %v196_v56  ;;  %v210_v63 = vadd.f32 %v195_v60, %v194_v57  ;;  %v219_v4 = vadd.f32 %v201_v13, %v200_v10 }
 0x123   :  { %v180_v14 = vsel %vm148_vm0, %v179_v2, %v1103_v51  ;;  %v182_v9 = vsel %vm148_vm0, %v181_v8, %v1105_v52  ;;  %v202_v21 = vmul.f32 %v192_v7, %v1257_v11  ;;  %v203_v22 = vmul.f32 %v193_v20, %v1259_v12 }
 0x124   :  { %217 = vadd.xlane.f32.xlu2 %v216_v61  ;;  %214 = vadd.xlane.f32.xlu1 %v213_v62  ;;  %v185_v17 = vsel %vm153_vm1, %v180_v14, 0.0  ;;  %v186_v5 = vsel %vm153_vm1, %v182_v9, 0.0  ;;  %v204_v24 = vmul.f32 %v192_v7, %v1265_v15  ;;  %v205_v26 = vmul.f32 %v193_v20, %v1267_v16  ;;  %v59_v9 = vld [vmem:[%s1411_s2 + $0x10] sm:$0xff] }
 0x125   :  { %211 = vadd.xlane.f32.xlu0 %v210_v63  ;;  %v187_v6 = vadd.f32 %v186_v5, %v185_v17  ;;  %v222_v23 = vadd.f32 %v203_v22, %v202_v21  ;;  %v206_v31 = vmul.f32 %v192_v7, %v1271_v18  ;;  %v207_v32 = vmul.f32 %v193_v20, %v1273_v19  ;;  %v57_v22 = vld [vmem:[%s1411_s2] sm:$0xff] }
 0x126   :  { %v225_v30 = vadd.f32 %v205_v26, %v204_v24  ;;  %v208_v34 = vmul.f32 %v192_v7, %v1283_v28  ;;  %v209_v11 = vmul.f32 %v193_v20, %v1285_v29  ;;  %v308_v10 = vlaneseq }
 0x127   :  { %v228_v33 = vadd.f32 %v207_v32, %v206_v31  ;;  %v348_v5 = vand.u32 4294901760, %v59_v9 }
 0x128   :  { %v231_v35 = vadd.f32 %v209_v11, %v208_v34  ;;  %v1323_v8 = vshrl.u32 %v308_v10, 7 }
 0x129   :  { %v382_v20 = vsub.f32 %v59_v9, %v348_v5 }
 0x12b   :  { %v383_v24 = vand.u32 4294901760, %v382_v20 }
 0x12c   :  { %220 = vadd.xlane.f32.xlu2 %v219_v4  ;;  %v60_v4 = vld [vmem:[%s1411_s2 + $0x18] sm:$0xff] }
 0x12d   :  { %v346_v14 = vand.u32 4294901760, %v60_v4  ;;  %v384_v32 = vsub.f32 %v382_v20, %v383_v24 }
 0x12f   :  { %v376_v17 = vsub.f32 %v60_v4, %v346_v14  ;;  %447 = vmatpush.msra.mxu3 %v346_v14  ;;  %347 = vmatpush.msra.mxu0 %v346_v14  ;;  %v385_v11 = vand.u32 4294901760, %v384_v32 }
 0x131   :  { %v377_v7 = vand.u32 4294901760, %v376_v17  ;;  %418 = vmatpush.msra.mxu2 %v376_v17  ;;  %449 = vmatpush.msra.mxu3 %v348_v5 }
 0x132   :  { %349 = vmatpush.msra.mxu0 %v348_v5 }
 0x133   :  { %421 = vmatpush.msra.mxu2 %v382_v20 }
 0x134   :  { %188 = vadd.xlane.f32.xlu2 %v187_v6  ;;  %v58_v6 = vld [vmem:[%s1411_s2 + $0x8] sm:$0xff]  ;;  %s1194_s2 = smov 120  }
 0x135   :  { %v350_v21 = vand.u32 4294901760, %v58_v6 }
 0x137   :  { %v388_v26 = vsub.f32 %v58_v6, %v350_v21  ;;  %451 = vmatpush.msra.mxu3 %v350_v21  ;;  %351 = vmatpush.msra.mxu0 %v350_v21 }
 0x139   :  { %424 = vmatpush.msra.mxu2 %v388_v26 }
 0x13c   :  { %223 = vadd.xlane.f32.xlu2 %v222_v23  ;;  %v378_v23 = vsub.f32 %v376_v17, %v377_v7 }
 0x13e   :  { %v379_v31 = vand.u32 4294901760, %v378_v23 }
 0x140   :  { %380 = vmatpush.msra.mxu1 %v379_v31 }
 0x142   :  { %386 = vmatpush.msra.mxu1 %v385_v11 }
 0x144   :  { %226 = vadd.xlane.f32.xlu2 %v225_v30  ;;  %v352_v30 = vand.u32 4294901760, %v57_v22 }
 0x146   :  { %v394_v34 = vsub.f32 %v57_v22, %v352_v30  ;;  %453 = vmatpush.msra.mxu3 %v352_v30  ;;  %353 = vmatpush.msra.mxu0 %v352_v30 }
 0x148   :  { %476 = vmatpush.msrb.mxu0 %v377_v7  ;;  %427 = vmatpush.msra.mxu2 %v394_v34 }
 0x14a   :  { %480 = vmatpush.msrb.mxu0 %v383_v24 }
 0x14c   :  { %229 = vadd.xlane.f32.xlu2 %v228_v33  ;;  %v389_v33 = vand.u32 4294901760, %v388_v26 }
 0x14e   :  { %484 = vmatpush.msrb.mxu0 %v389_v33 }
 0x154   :  { %232 = vadd.xlane.f32.xlu2 %v231_v35  ;;  %v390_v35 = vsub.f32 %v388_v26, %v389_v33 }
 0x197   :  { %v218_v12 = vpop.xlane.xlu2 %217  ;;  %v215_v53 = vpop.xlane.xlu1 %214 }
 0x198   :  { %v212_v54 = vpop.xlane.xlu0 %211 }
 0x19f   :  { %v221_v36 = vpop.xlane.xlu2 %220 }
 0x1a7   :  { %v189_v37 = vpop.xlane.xlu2 %188 }
 0x1a8   :  { %v235_v15 = vperm.slane %v189_v37, 0  ;;  %v236_v38 = vperm.slane %v189_v37, 1 }
 0x1aa   :  { %1110 = vrcp.f32 %v235_v15  ;;  %v250_v43 = vand.u32 2147483648, %v235_v15  ;;  %v268_v28 = vand.u32 2147483648, %v236_v38  ;;  %v248_v29 = vand.u32 2147483647, %v235_v15 }
 0x1ab   :  { %1112 = vrcp.f32 %v236_v38  ;;  %v266_v46 = vand.u32 2147483647, %v236_v38  ;;  %vm244_vm4 = vweird.f32 %v235_v15  ;;  %vm262_vm5 = vweird.f32 %v236_v38 }
 0x1ac   :  { %v251_v50 = vor.u32 1.1754944e-38, %v250_v43  ;;  %v269_v51 = vor.u32 1.1754944e-38, %v268_v28  ;;  %vm249_vm8 = vcmp.eq.f32.partialorder %v248_v29, 8.507059e+37 }
 0x1ad   :  { %vm267_vm9 = vcmp.eq.f32.partialorder %v266_v46, 8.507059e+37 }
 0x1af   :  { %v224_v16 = vpop.xlane.xlu2 %223 }
 0x1b0   :  { %v1111_v39 = vpop.eup %1110 }
 0x1b1   :  { %v1113_v18 = vpop.eup %1112  ;;  %v240_v40 = vmul.f32 %v1111_v39, %v235_v15  ;;  %vm245_vm2 = vweird.f32 %v1111_v39 }
 0x1b2   :  { %v258_v19 = vmul.f32 %v1113_v18, %v236_v38  ;;  %vm263_vm3 = vweird.f32 %v1113_v18  ;;  %vm246_vm6 = vmor %vm244_vm4, %vm245_vm2 }
 0x1b3   :  { %v241_v41 = vsub.f32 1.0, %v240_v40  ;;  %vm264_vm7 = vmor %vm262_vm5, %vm263_vm3  ;;  %vm588_vm3 = vcmask 64512  }
 0x1b4   :  { %v259_v42 = vsub.f32 1.0, %v258_v19 }
 0x1b5   :  { %v242_v44 = vmul.f32 %v1111_v39, %v241_v41 }
 0x1b6   :  { %v260_v45 = vmul.f32 %v1113_v18, %v259_v42 }
 0x1b7   :  { %v227_v47 = vpop.xlane.xlu2 %226  ;;  %v243_v48 = vadd.f32 %v1111_v39, %v242_v44 }
 0x1b8   :  { %v261_v49 = vadd.f32 %v1113_v18, %v260_v45 }
 0x1b9   :  { %v247_v52 = vsel %vm246_vm6, %v1111_v39, %v243_v48 }
 0x1ba   :  { %v265_v55 = vsel %vm264_vm7, %v1113_v18, %v261_v49  ;;  %v252_v56 = vsel %vm249_vm8, %v251_v50, %v247_v52  ;;  %v309_v18 = vand.u32 127, %v308_v10  ;;  %v275_v10 = vperm.slane %v1242_v3, 1 }
 0x1bb   :  { %v270_v57 = vsel %vm267_vm9, %v269_v51, %v265_v55  ;;  %v254_v58 = vmul.f32 %v252_v56, %v215_v53  ;;  %v253_v59 = vmul.f32 %v252_v56, %v212_v54  ;;  %v255_v63 = vmul.f32 %v252_v56, %v218_v12 }
 0x1bc   :  { %v271_v60 = vmul.f32 %v270_v57, %v224_v16  ;;  %v272_v62 = vmul.f32 %v270_v57, %v227_v47  ;;  %v256_v0 = vmul.f32 %v252_v56, %v221_v36  ;;  %v395_v12 = vand.u32 4294901760, %v394_v34 }
 0x1bd   :  { %288 = vperm.xlu1 %1087, %v254_v58   ;;  %285 = vperm.xlu0 %1086, %v253_v59   ;;  %v391_v36 = vand.u32 4294901760, %v390_v35  ;;  %v311_v40 = vadd.s32 4294967288, %v309_v18  ;;  %v315_v42 = vadd.s32 4294967280, %v309_v18  ;;  %v319_v29 = vadd.s32 4294967272, %v309_v18 }
 0x1be   :  { %297 = vperm.xlu2 %1088, %v271_v60   ;;  %v396_v37 = vsub.f32 %v394_v34, %v395_v12  ;;  %488 = vmatpush.msrb.mxu0 %v395_v12 }
 0x1bf   :  { %v230_v61 = vpop.xlane.xlu2 %229  ;;  %392 = vmatpush.msra.mxu1 %v391_v36 }
 0x1c0   :  { %v273_v13 = vmul.f32 %v270_v57, %v230_v61  ;;  %v397_v15 = vand.u32 4294901760, %v396_v37 }
 0x1c2   :  { %398 = vmatpush.msra.mxu1 %v397_v15 }
 0x1c4   :  { %507 = vmatpush.msrb.mxu1 %v346_v14 }
 0x1c5   :  { %291 = vperm.xlu1 %1087, %v255_v63   ;;  %300 = vperm.xlu0 %1086, %v272_v62  }
 0x1c6   :  { %294 = vperm.xlu2 %1088, %v256_v0   ;;  %509 = vmatpush.msrb.mxu1 %v348_v5 }
 0x1c7   :  { %v233_v1 = vpop.xlane.xlu2 %232 }
 0x1c8   :  { %v274_v2 = vmul.f32 %v270_v57, %v233_v1  ;;  %511 = vmatpush.msrb.mxu1 %v350_v21 }
 0x1ca   :  { %513 = vmatpush.msrb.mxu1 %v352_v30  ;;  %v1195_v30 = vmov 8.0  }
 0x1cb   :  { %1114 = vrcp.f32 %v1195_v30 }
 0x1cd   :  { %303 = vperm.xlu0 %1086, %v273_v13   ;;  %306 = vperm.xlu1 %1087, %v274_v2  }
 0x1ce   :  { %1089 = vset.pattern.permute.xlu2 %v1323_v8 }
 0x1d1   :  { %v1115_v31 = vpop.eup %1114 }
 0x1d2   :  { %v524_v32 = vmul.f32 8.0, %v1115_v31  ;;  %vm528_vm15 = vweird.f32 %v1115_v31 }
 0x1d4   :  { %v525_v33 = vsub.f32 1.0, %v524_v32 }
 0x1d6   :  { %v526_v34 = vmul.f32 %v1115_v31, %v525_v33 }
 0x1d8   :  { %v527_v11 = vadd.f32 %v1115_v31, %v526_v34 }
 0x1da   :  { %v1343_v35 = vsel %vm528_vm15, %v1115_v31, %v527_v11  ;;  %v1373_v11 = vadd.s32 24, %v1323_v8 }
 0x218   :  { %v298_v39 = vpop.permute.xlu2 %297 }
 0x219   :  { %v323_v47 = vperm.slane %v298_v39, %v309_v18 }
 0x220   :  { %v295_v46 = vpop.permute.xlu2 %294 }
 0x221   :  { %v320_v54 = vperm.slane %v295_v46, %v319_v29 }
 0x22f   :  { %v289_v38 = vpop.permute.xlu1 %288  ;;  %v286_v16 = vpop.permute.xlu0 %285 }
 0x230   :  { %v312_v43 = vperm.slane %v289_v38, %v311_v40  ;;  %v310_v28 = vperm.slane %v286_v16, %v309_v18 }
 0x232   :  { %v314_v48 = vsel %vm313_vm10, %v312_v43, %v310_v28 }
 0x237   :  { %v292_v19 = vpop.permute.xlu1 %291  ;;  %v301_v41 = vpop.permute.xlu0 %300 }
 0x238   :  { %v316_v44 = vperm.slane %v292_v19, %v315_v42  ;;  %v324_v45 = vperm.slane %v301_v41, %v311_v40  ;;  %v61_v19 = vld [vmem:[%s1412_s3] sm:$0xff] }
 0x239   :  { %v607_v41 = vand.u32 4294901760, %v61_v19 }
 0x23a   :  { %v318_v51 = vsel %vm317_vm11, %v316_v44, %v314_v48  ;;  %v325_v55 = vsel %vm313_vm10, %v324_v45, %v323_v47 }
 0x23b   :  { %v322_v57 = vsel %vm321_vm12, %v320_v54, %v318_v51  ;;  %608 = vmatpush.msrb.mxu2 %v607_v41 }
 0x23f   :  { %v304_v49 = vpop.permute.xlu0 %303  ;;  %v307_v50 = vpop.permute.xlu1 %306 }
 0x240   :  { %v326_v52 = vperm.slane %v304_v49, %v315_v42  ;;  %v328_v53 = vperm.slane %v307_v50, %v319_v29  ;;  %v634_v42 = vsub.f32 %v61_v19, %v607_v41 }
 0x242   :  { %v327_v56 = vsel %vm317_vm11, %v326_v52, %v325_v55  ;;  %v635_v43 = vand.u32 4294901760, %v634_v42 }
 0x243   :  { %v329_v58 = vsel %vm321_vm12, %v328_v53, %v327_v56  ;;  %v549_v53 = vperm.slane %v1242_v3, 2  ;;  %v551_v56 = vperm.slane %v1242_v3, 3 }
 0x244   :  { %v330_v59 = vsel %vm148_vm0, %v329_v58, %v322_v57  ;;  %v636_v44 = vsub.f32 %v634_v42, %v635_v43 }
 0x245   :  { %v332_v60 = vsel %vm331_vm13, %v330_v59, 0 }
 0x246   :  { %v354_v61 = vand.u32 4294901760, %v332_v60  ;;  %v637_v45 = vand.u32 4294901760, %v636_v44 }
 0x248   :  { %400 = vmatmul.f32.vlgmr.msra.gmra.mxu1 %v354_v61  ;;  %v355_v62 = vsub.f32 %v332_v60, %v354_v61  ;;  %638 = vmatpush.msrb.mxu3 %v637_v45 }
 0x249   :  { %684 = vmatpush.msra.mxu1 %v607_v41 }
 0x24a   :  { %430 = vmatmul.f32.vlgmr.msra.gmra.mxu2 %v355_v62  ;;  %v356_v63 = vand.u32 4294901760, %v355_v62 }
 0x24b   :  { %710 = vmatpush.msra.mxu2 %v635_v43  ;;  %v62_v43 = vld [vmem:[%s1412_s3 + $0x8] sm:$0xff]  ;;  %s1196_s3 = smov [#allocation5]  }
 0x24c   :  { %457 = vmatmul.f32.vlgmr.msra.gmra.mxu3 %v356_v63  ;;  %v357_v0 = vsub.f32 %v355_v62, %v356_v63  ;;  %s1061_s20 = sshll.u32 %s1196_s3, 4  ;;  %s1062_s20 = int_to_ptr.vmem [resolvable:$true] %s1061_s20 }
 0x24d   :  { %732 = vmatpush.msra.mxu3 %v607_v41 }
 0x24e   :  { %v358_v1 = vand.u32 4294901760, %v357_v0 }
 0x250   :  { %359 = vmatmul.f32.vlgmr.msra.gmra.mxu0 %v358_v1  ;;  %515 = vmatmul.f32.vlgmr.msrb.gmra.mxu1 %v354_v61 }
 0x251   :  { %661 = vmatpush.msra.mxu0 %v634_v42 }
 0x258   :  { %490 = vmatmul.f32.vlgmr.msrb.gmra.mxu0 %v354_v61 }
 0x2c5   :  { %v401_v13 = vpop.f32.mrf.mxu1 }
 0x2cd   :  { %v360_v2 = vpop.f32.mrf.mxu0  ;;  %v431_v9 = vpop.f32.mrf.mxu2 }
 0x2ce   :  { %v361_v4 = vadd.f32 %v360_v2, %v275_v10  ;;  %v516_v21 = vpop.f32.mrf.mxu1  ;;  %v924_v2 = vadd.s32 16, %v1323_v8 }
 0x2cf   :  { %v458_v5 = vpop.f32.mrf.mxu3 }
 0x2d0   :  { %v402_v14 = vadd.f32 %v401_v13, %v361_v4  ;;  %1091 = vset.pattern.permute.xlu1 %v924_v2  ;;  %v587_v4 = vperm.slane %v1242_v3, 4 }
 0x2d2   :  { %v432_v17 = vadd.f32 %v431_v9, %v402_v14 }
 0x2d4   :  { %v459_v6 = vadd.f32 %v458_v5, %v432_v17 }
 0x2d5   :  { %v491_v7 = vpop.f32.mrf.mxu0 }
 0x2d6   :  { %v492_v20 = vadd.f32 %v491_v7, %v459_v6 }
 0x2d8   :  { %v517_v22 = vadd.f32 %v516_v21, %v492_v20  ;;  %v1368_v21 = vadd.s32 8, %v1323_v8 }
 0x2da   :  { %555 = vrot.lane.b32.xlu0 %v517_v22, %s1194_s2  ;;  %v520_v23 = vsel %vm519_vm14, %v517_v22, 0.0 }
 0x2db   :  { %1090 = vset.pattern.permute.xlu0 %v1368_v21 }
 0x304   :  { %521 = vadd.xlane.f32.xlu0 %v520_v23 }
 0x34c   :  { %v556_v24 = vpop.permute.xlu0 %555 }
 0x34d   :  { %v558_v26 = vsel %vm519_vm14, %v556_v24, 0.0 }
 0x34e   :  { %559 = vadd.xlane.f32.xlu2 %v558_v26 }
 0x377   :  { %v522_v12 = vpop.xlane.xlu0 %521 }
 0x378   :  { %v530_v36 = vmul.f32 %v1343_v35, %v522_v12 }
 0x37a   :  { %v531_v37 = vsub.f32 %v517_v22, %v530_v36 }
 0x37c   :  { %v532_v15 = vmul.f32 %v531_v37, %v531_v37 }
 0x37e   :  { %v533_v38 = vsel %vm519_vm14, %v532_v15, 0.0 }
 0x37f   :  { %534 = vadd.xlane.f32.xlu2 %v533_v38 }
 0x3c1   :  { %v560_v16 = vpop.xlane.xlu2 %559 }
 0x3c2   :  { %v561_v39 = vmul.f32 %v560_v16, %v1343_v35 }
 0x3c4   :  { %v1348_v18 = vsub.f32 %v517_v22, %v561_v39 }
 0x3c6   :  { %v563_v40 = vmul.f32 %v1348_v18, %v1348_v18 }
 0x3c8   :  { %565 = vrot.lane.b32.xlu1 %v563_v40, %s1194_s2 }
 0x3f2   :  { %v535_v28 = vpop.xlane.xlu2 %534 }
 0x3f3   :  { %v536_v29 = vmul.f32 %v535_v28, %v1343_v35 }
 0x3f5   :  { %v537_v46 = vadd.f32 1e-05, %v536_v29 }
 0x3f7   :  { %1116 = vrsqrt.f32 %v537_v46  ;;  %vm544_vm1 = vweird.f32 %v537_v46 }
 0x3fd   :  { %v1117_v47 = vpop.eup %1116 }
 0x3fe   :  { %v539_v48 = vmul.f32 %v1117_v47, %v537_v46  ;;  %vm545_vm0 = vweird.f32 %v1117_v47 }
 0x3ff   :  { %vm546_vm2 = vmor %vm544_vm1, %vm545_vm0 }
 0x400   :  { %v540_v49 = vmul.f32 %v1117_v47, %v539_v48 }
 0x402   :  { %v541_v50 = vmul.f32 0.5, %v540_v49 }
 0x404   :  { %v542_v51 = vsub.f32 1.5, %v541_v50 }
 0x406   :  { %v543_v52 = vmul.f32 %v1117_v47, %v542_v51 }
 0x408   :  { %v547_v54 = vsel %vm546_vm2, %v1117_v47, %v543_v52 }
 0x409   :  { %v548_v55 = vmul.f32 %v547_v54, %v531_v37 }
 0x40b   :  { %v550_v57 = vmul.f32 %v549_v53, %v548_v55 }
 0x40d   :  { %v552_v58 = vadd.f32 %v551_v56, %v550_v57 }
 0x40f   :  { %v553_v59 = vmax.f32 %v552_v58, 0.0 }
 0x411   :  { %v590_v60 = vsel %vm588_vm3, %v553_v59, 0 }
 0x412   :  { %v609_v61 = vand.u32 4294901760, %v590_v60 }
 0x414   :  { %640 = vmatmul.f32.vlgmr.msrb.gmra.mxu3 %v609_v61  ;;  %v610_v62 = vsub.f32 %v590_v60, %v609_v61 }
 0x416   :  { %664 = vmatmul.f32.vlgmr.msra.gmra.mxu0 %v610_v62  ;;  %v611_v63 = vand.u32 4294901760, %v610_v62 }
 0x418   :  { %688 = vmatmul.f32.vlgmr.msra.gmra.mxu1 %v611_v63  ;;  %v612_v0 = vsub.f32 %v610_v62, %v611_v63 }
 0x41a   :  { %v613_v1 = vand.u32 4294901760, %v612_v0 }
 0x41c   :  { %614 = vmatmul.f32.vlgmr.msrb.gmra.mxu2 %v613_v1  ;;  %734 = vmatmul.f32.vlgmr.msra.gmra.mxu3 %v609_v61 }
 0x424   :  { %712 = vmatmul.f32.vlgmr.msra.gmra.mxu2 %v609_v61 }
 0x43a   :  { %v566_v10 = vpop.permute.xlu1 %565 }
 0x43b   :  { %v568_v13 = vsel %vm519_vm14, %v566_v10, 0.0 }
 0x43c   :  { %569 = vadd.xlane.f32.xlu1 %v568_v13 }
 0x493   :  { %v665_v6 = vpop.f32.mrf.mxu0 }
 0x495   :  { %v689_v20 = vpop.f32.mrf.mxu1 }
 0x497   :  { %v641_v14 = vpop.f32.mrf.mxu3 }
 0x49f   :  { %v615_v9 = vpop.f32.mrf.mxu2  ;;  %v735_v26 = vpop.f32.mrf.mxu3 }
 0x4a0   :  { %v616_v17 = vadd.f32 %v615_v9, %v587_v4 }
 0x4a2   :  { %v642_v5 = vadd.f32 %v641_v14, %v616_v17 }
 0x4a4   :  { %v666_v7 = vadd.f32 %v665_v6, %v642_v5 }
 0x4a6   :  { %v690_v22 = vadd.f32 %v689_v20, %v666_v7 }
 0x4a7   :  { %v713_v23 = vpop.f32.mrf.mxu2 }
 0x4a8   :  { %v714_v24 = vadd.f32 %v713_v23, %v690_v22 }
 0x4aa   :  { %v736_v30 = vadd.f32 %v735_v26, %v714_v24 }
 0x4ac   :  { %v975_v31 = vperm.slane %v736_v30, 0  ;;  %v1377_v37 = vperm.slane %v736_v30, 1 }
 0x4ae   :  { %992 = vperm.xlu1 %1091, %v975_v31   ;;  %980 = vperm.xlu2 %1089, %v975_v31  }
 0x4af   :  { %v570_v32 = vpop.xlane.xlu1 %569 }
 0x4b0   :  { %v571_v33 = vmul.f32 %v570_v32, %v1343_v35 }
 0x4b2   :  { %v572_v34 = vadd.f32 1e-05, %v571_v33  ;;  %v1125_v33 = vld [vmem:[#allocation2 + $0x8] sm:$0xff] }
 0x4b4   :  { %1118 = vrsqrt.f32 %v572_v34  ;;  %vm579_vm5 = vweird.f32 %v572_v34 }
 0x4b6   :  { %1093 = vset.pattern.permute.xlu1 %v1323_v8  ;;  %1092 = vset.pattern.permute.xlu2 %v1373_v11 }
 0x4ba   :  { %v1119_v12 = vpop.eup %1118 }
 0x4bb   :  { %v574_v36 = vmul.f32 %v1119_v12, %v572_v34  ;;  %vm580_vm4 = vweird.f32 %v1119_v12 }
 0x4bc   :  { %vm581_vm6 = vmor %vm579_vm5, %vm580_vm4 }
 0x4bd   :  { %v575_v15 = vmul.f32 %v1119_v12, %v574_v36 }
 0x4be   :  { %1005 = vperm.xlu1 %1093, %v1377_v37   ;;  %998 = vperm.xlu2 %1092, %v975_v31  }
 0x4bf   :  { %v576_v38 = vmul.f32 0.5, %v575_v15 }
 0x4c1   :  { %v577_v16 = vsub.f32 1.5, %v576_v38 }
 0x4c3   :  { %v578_v35 = vmul.f32 %v1119_v12, %v577_v16 }
 0x4c5   :  { %v582_v39 = vsel %vm581_vm6, %v1119_v12, %v578_v35 }
 0x4c6   :  { %v583_v40 = vmul.f32 %v582_v39, %v1348_v18  ;;  %1095 = vset.pattern.permute.xlu1 %v1368_v21  ;;  %1094 = vset.pattern.permute.xlu2 %v1323_v8  ;;  %v759_v18 = vand.u32 4294901760, %v62_v43 }
 0x4c8   :  { %v584_v19 = vmul.f32 %v583_v40, %v549_v53  ;;  %v786_v28 = vsub.f32 %v62_v43, %v759_v18  ;;  %760 = vmatpush.msrb.mxu0 %v759_v18  ;;  %836 = vmatpush.msrb.mxu3 %v759_v18  ;;  %v738_v53 = vperm.slane %v1242_v3, 5  ;;  %v1127_v43 = vld [vmem:[#allocation2 + $0x18] sm:$0xff] }
 0x4ca   :  { %v585_v41 = vadd.f32 %v584_v19, %v551_v56  ;;  %813 = vmatpush.msrb.mxu2 %v786_v28  ;;  %v787_v44 = vand.u32 4294901760, %v786_v28 }
 0x4cc   :  { %v586_v42 = vmax.f32 %v585_v41, 0.0  ;;  %v788_v29 = vsub.f32 %v786_v28, %v787_v44  ;;  %862 = vmatpush.msra.mxu0 %v787_v44  ;;  %v1126_v41 = vld [vmem:[#allocation2 + $0x10] sm:$0xff]  ;;  %v1128_v28 = vld [vmem:[#allocation2 + $0x20] sm:$0xff] }
 0x4ce   :  { %740 = vrot.lane.b32.xlu0 %v586_v42, %s1194_s2  ;;  %v789_v45 = vand.u32 4294901760, %v788_v29  ;;  %v1129_v29 = vld [vmem:[#allocation2 + $0x28] sm:$0xff] }
 0x4d0   :  { %790 = vmatpush.msrb.mxu1 %v789_v45 }
 0x4d2   :  { %884 = vmatpush.msra.mxu1 %v759_v18 }
 0x4d6   :  { %986 = vperm.xlu0 %1090, %v975_v31   ;;  %v1124_v31 = vld [vmem:[#allocation2] sm:$0xff] }
 0x4de   :  { %1096 = vset.pattern.permute.xlu0 %v924_v2 }
 0x508   :  { %v981_v26 = vpop.permute.xlu2 %980 }
 0x540   :  { %v741_v46 = vpop.permute.xlu0 %740 }
 0x541   :  { %v742_v47 = vsel %vm588_vm3, %v741_v46, 0 }
 0x542   :  { %v761_v48 = vand.u32 4294901760, %v742_v47 }
 0x544   :  { %v762_v49 = vsub.f32 %v742_v47, %v761_v48  ;;  %792 = vmatmul.f32.vlgmr.msrb.gmra.mxu1 %v761_v48 }
 0x546   :  { %v763_v50 = vand.u32 4294901760, %v762_v49  ;;  %816 = vmatmul.f32.vlgmr.msrb.gmra.mxu2 %v762_v49 }
 0x548   :  { %v764_v51 = vsub.f32 %v762_v49, %v763_v50  ;;  %840 = vmatmul.f32.vlgmr.msrb.gmra.mxu3 %v763_v50  ;;  %v1130_v50 = vld [vmem:[#allocation2 + $0x60] sm:$0xff] }
 0x54a   :  { %v765_v52 = vand.u32 4294901760, %v764_v51 }
 0x54c   :  { %766 = vmatmul.f32.vlgmr.msrb.gmra.mxu0 %v765_v52  ;;  %886 = vmatmul.f32.vlgmr.msra.gmra.mxu1 %v761_v48  ;;  %v1131_v52 = vld [vmem:[#allocation2 + $0x50] sm:$0xff] }
 0x554   :  { %864 = vmatmul.f32.vlgmr.msra.gmra.mxu0 %v761_v48 }
 0x5c1   :  { %v793_v54 = vpop.f32.mrf.mxu1 }
 0x5c9   :  { %v767_v55 = vpop.f32.mrf.mxu0  ;;  %v817_v58 = vpop.f32.mrf.mxu2 }
 0x5ca   :  { %v768_v56 = vadd.f32 %v767_v55, %v738_v53  ;;  %v887_v0 = vpop.f32.mrf.mxu1 }
 0x5cb   :  { %v841_v60 = vpop.f32.mrf.mxu3 }
 0x5cc   :  { %v794_v57 = vadd.f32 %v793_v54, %v768_v56  ;;  %v1132_v56 = vld [vmem:[#allocation2 + $0x58] sm:$0xff] }
 0x5ce   :  { %v818_v59 = vadd.f32 %v817_v58, %v794_v57  ;;  %v1133_v58 = vld [vmem:[#allocation2 + $0x40] sm:$0xff] }
 0x5d0   :  { %v842_v61 = vadd.f32 %v841_v60, %v818_v59  ;;  %v1134_v60 = vld [vmem:[#allocation2 + $0x48] sm:$0xff] }
 0x5d1   :  { %v865_v62 = vpop.f32.mrf.mxu0 }
 0x5d2   :  { %v866_v63 = vadd.f32 %v865_v62, %v842_v61 }
 0x5d4   :  { %v888_v1 = vadd.f32 %v887_v0, %v866_v63  ;;  %v1135_v0 = vld [vmem:[#allocation2 + $0x68] sm:$0xff] }
 0x5d6   :  { %v1076_v10 = vmul.f32 -1.442695, %v888_v1 }
 0x5d8   :  { %1120 = vpow2.f32 %v1076_v10 }
 0x5de   :  { %v1121_v13 = vpop.eup %1120 }
 0x5df   :  { %v893_v2 = vadd.f32 1.0, %v1121_v13 }
 0x5e1   :  { %1122 = vrcp.f32 %v893_v2  ;;  %v905_v9 = vand.u32 2147483648, %v893_v2  ;;  %v903_v5 = vand.u32 2147483647, %v893_v2  ;;  %vm899_vm8 = vweird.f32 %v893_v2 }
 0x5e3   :  { %v906_v7 = vor.u32 1.1754944e-38, %v905_v9  ;;  %vm904_vm10 = vcmp.eq.f32.partialorder %v903_v5, 8.507059e+37  ;;  %v1136_v9 = vld [vmem:[#allocation2 + $0x70] sm:$0xff]  ;;  %v1137_v5 = vld [vmem:[#allocation2 + $0x78] sm:$0xff] }
 0x5e7   :  { %v1123_v4 = vpop.eup %1122 }
 0x5e8   :  { %v895_v14 = vmul.f32 %v1123_v4, %v893_v2  ;;  %vm900_vm7 = vweird.f32 %v1123_v4 }
 0x5e9   :  { %vm901_vm9 = vmor %vm899_vm8, %vm900_vm7 }
 0x5ea   :  { %v896_v3 = vsub.f32 1.0, %v895_v14 }
 0x5ec   :  { %v897_v17 = vmul.f32 %v1123_v4, %v896_v3 }
 0x5ee   :  { %v898_v6 = vadd.f32 %v1123_v4, %v897_v17 }
 0x5f0   :  { %v902_v20 = vsel %vm901_vm9, %v1123_v4, %v898_v6 }
 0x5f1   :  { %v907_v22 = vsel %vm904_vm10, %v906_v7, %v902_v20 }
 0x5f2   :  { %v909_v23 = vperm.slane %v907_v22, 0  ;;  %v934_v24 = vperm.slane %v907_v22, 1 }
 0x5f4   :  { %926 = vperm.xlu0 %1096, %v909_v23   ;;  %920 = vperm.xlu1 %1095, %v909_v23  }
 0x5f5   :  { %914 = vperm.xlu2 %1094, %v909_v23  }
 0x5fc   :  { %951 = vperm.xlu0 %1096, %v934_v24   ;;  %1098 = vset.pattern.permute.xlu1 %v1323_v8  ;;  %v999_v8 = vpop.permute.xlu2 %998 }
 0x5fd   :  { %1097 = vset.pattern.permute.xlu2 %v1373_v11 }
 0x604   :  { %1017 = vperm.xlu0 %1096, %v1377_v37   ;;  %939 = vperm.xlu1 %1098, %v934_v24  }
 0x605   :  { %932 = vperm.xlu2 %1097, %v909_v23  }
 0x60c   :  { %1100 = vset.pattern.permute.xlu1 %v1373_v11  ;;  %1101 = vset.pattern.permute.xlu0 %v1373_v11  ;;  %v993_v11 = vpop.permute.xlu1 %992 }
 0x60d   :  { %1099 = vset.pattern.permute.xlu2 %v1368_v21  ;;  %v987_v21 = vpop.permute.xlu0 %986 }
 0x614   :  { %957 = vperm.xlu1 %1100, %v934_v24   ;;  %v1006_v15 = vpop.permute.xlu1 %1005 }
 0x615   :  { %945 = vperm.xlu2 %1099, %v934_v24  }
 0x61c   :  { %1023 = vperm.xlu1 %1100, %v1377_v37  }
 0x61d   :  { %1011 = vperm.xlu2 %1099, %v1377_v37  }
 0x64f   :  { %v915_v30 = vpop.permute.xlu2 %914 }
 0x650   :  { %v959_v32 = vmul.f32 %v1124_v31, %v915_v30  ;;  %v960_v34 = vmul.f32 %v1125_v33, %v915_v30 }
 0x652   :  { %v1025_v12 = vadd.f32 %v981_v26, %v959_v32  ;;  %v1026_v36 = vadd.f32 %v981_v26, %v960_v34 }
 0x654   :  { %1041 = vst [vmem:[#allocation5] sm:$0xff] %v1025_v12 }
 0x655   :  { %1042 = vst [vmem:[#allocation5 + $0x8] sm:$0xff] %v1026_v36 }
 0x65f   :  { %v933_v38 = vpop.permute.xlu2 %932 }
 0x660   :  { %v965_v16 = vmul.f32 %v933_v38, %v1279_v25  ;;  %v966_v35 = vmul.f32 %v933_v38, %v1281_v27 }
 0x662   :  { %v1031_v37 = vadd.f32 %v999_v8, %v965_v16  ;;  %v1032_v39 = vadd.f32 %v999_v8, %v966_v35 }
 0x664   :  { %1047 = vst [vmem:[#allocation5 + $0x30] sm:$0xff] %v1031_v37 }
 0x665   :  { %1048 = vst [vmem:[#allocation5 + $0x38] sm:$0xff] %v1032_v39 }
 0x666   :  { %v921_v40 = vpop.permute.xlu1 %920  ;;  %v927_v19 = vpop.permute.xlu0 %926 }
 0x667   :  { %v961_v42 = vmul.f32 %v1126_v41, %v921_v40  ;;  %v962_v18 = vmul.f32 %v1127_v43, %v921_v40  ;;  %v963_v44 = vmul.f32 %v1128_v28, %v927_v19  ;;  %v964_v45 = vmul.f32 %v1129_v29, %v927_v19 }
 0x669   :  { %v1027_v46 = vadd.f32 %v987_v21, %v961_v42  ;;  %v1028_v47 = vadd.f32 %v987_v21, %v962_v18  ;;  %v1029_v48 = vadd.f32 %v993_v11, %v963_v44  ;;  %v1030_v25 = vadd.f32 %v993_v11, %v964_v45 }
 0x66b   :  { %1043 = vst [vmem:[#allocation5 + $0x10] sm:$0xff] %v1027_v46 }
 0x66c   :  { %1044 = vst [vmem:[#allocation5 + $0x18] sm:$0xff] %v1028_v47 }
 0x66d   :  { %1045 = vst [vmem:[#allocation5 + $0x20] sm:$0xff] %v1029_v48 }
 0x66e   :  { %1046 = vst [vmem:[#allocation5 + $0x28] sm:$0xff] %v1030_v25  ;;  %v952_v27 = vpop.permute.xlu0 %951 }
 0x66f   :  { %v946_v49 = vpop.permute.xlu2 %945  ;;  %v971_v51 = vmul.f32 %v1130_v50, %v952_v27  ;;  %v972_v1 = vmul.f32 %v1135_v0, %v952_v27 }
 0x670   :  { %v969_v53 = vmul.f32 %v1131_v52, %v946_v49  ;;  %v970_v57 = vmul.f32 %v1132_v56, %v946_v49 }
 0x676   :  { %v940_v54 = vpop.permute.xlu1 %939  ;;  %v1018_v55 = vpop.permute.xlu0 %1017 }
 0x677   :  { %v967_v59 = vmul.f32 %v1133_v58, %v940_v54  ;;  %v968_v61 = vmul.f32 %v1134_v60, %v940_v54  ;;  %v1012_v62 = vpop.permute.xlu2 %1011  ;;  %v1037_v63 = vadd.f32 %v1018_v55, %v971_v51  ;;  %v1038_v14 = vadd.f32 %v1018_v55, %v972_v1 }
 0x678   :  { %v1035_v10 = vadd.f32 %v1012_v62, %v969_v53  ;;  %v1036_v4 = vadd.f32 %v1012_v62, %v970_v57 }
 0x679   :  { %v1033_v13 = vadd.f32 %v1006_v15, %v967_v59  ;;  %v1034_v2 = vadd.f32 %v1006_v15, %v968_v61  ;;  %1053 = vst [vmem:[#allocation5 + $0x60] sm:$0xff] %v1037_v63 }
 0x67a   :  { %1051 = vst [vmem:[#allocation5 + $0x50] sm:$0xff] %v1035_v10 }
 0x67b   :  { %1049 = vst [vmem:[#allocation5 + $0x40] sm:$0xff] %v1033_v13 }
 0x67c   :  { %1050 = vst [vmem:[#allocation5 + $0x48] sm:$0xff] %v1034_v2 }
 0x67d   :  { %1052 = vst [vmem:[#allocation5 + $0x58] sm:$0xff] %v1036_v4 }
 0x67e   :  { %1054 = vst [vmem:[#allocation5 + $0x68] sm:$0xff] %v1038_v14 }
 0x686   :  { %v958_v3 = vpop.permute.xlu1 %957 }
 0x687   :  { %v973_v17 = vmul.f32 %v1136_v9, %v958_v3  ;;  %v974_v6 = vmul.f32 %v1137_v5, %v958_v3 }
 0x68e   :  { %v1024_v7 = vpop.permute.xlu1 %1023 }
 0x68f   :  { %v1039_v20 = vadd.f32 %v1024_v7, %v973_v17  ;;  %v1040_v22 = vadd.f32 %v1024_v7, %v974_v6 }
 0x691   :  { %1055 = vst [vmem:[#allocation5 + $0x70] sm:$0xff] %v1039_v20 }
 0x692   :  { %1056 = vst [vmem:[#allocation5 + $0x78] sm:$0xff] %v1040_v22 }
 0x693   :  { %1069 = dma.vmem_to_hbm [thread:$0]  %s1062_s20, 2048, %s1064_s25, [#allocation4], %s1191_s23, %s1191_s23, %s1192_s24  }
 0x694   :  { %1188 = dma.done.wait [#allocation4], 2048  }
 0x695   :  { %1189 = vsyncadd [#allocation4], 4294965248 }
 0x696   :  { %1074 = vsyncpa [#allocation3], 1 }
 0x697   :  { %1075 = vsyncpa [#allocation4], 1 }

// kernel: tpu_custom_call.1
= control target key start
LH: loop header
LB: loop body
LE: loop exit
PB: predicated region body
PF: predicated region fallthrough
CT: control target
= control target key end

     0   :  { %10 = vsyncpa [#allocation3], 0  ;;  %s1409_s0 = inlined_call_operand.hbm [shape: f32[2,32,256], index: 0, kind: input, shape index: {}]   ;;  %s1410_s1 = inlined_call_operand.vmem [shape: f32[32,1], index: 1, kind: input, shape index: {}]   ;;  %s1411_s2 = inlined_call_operand.vmem [shape: f32[32,16], index: 2, kind: input, shape index: {}]   ;;  %s1412_s3 = inlined_call_operand.vmem [shape: f32[16,32], index: 3, kind: input, shape index: {}]   ;;  %s1413_s4 = inlined_call_operand.vmem [shape: f32[8,32], index: 4, kind: input, shape index: {}]   ;;  %s1414_s5 = inlined_call_operand.hbm [shape: f32[2,32,256], index: 5, kind: output, shape index: {}]  }
   0x1   :  { %11 = vsyncpa [#allocation4], 0  ;;  %s16_s20 = sshll.u32 %s1409_s0, 4  ;;  %s1190_s21 = smov [#allocation2]   ;;  %s17_s20 = int_to_ptr.hbm [resolvable:$true] %s16_s20 }
   0x2   :  { %s18_s22 = sshll.u32 %s1190_s21, 4  ;;  %s1191_s23 = smov 256   ;;  %s19_s22 = int_to_ptr.vmem [resolvable:$true] %s18_s22 }
   0x3   :  { %s1192_s24 = smov 16  }
   0x4   :  { %24 = dma.hbm_to_vmem [thread:$0]  %s17_s20, 2048, %s19_s22, [#allocation3], %s1191_s23, %s1191_s23, %s1192_s24  }
   0x5   :  { %1186 = dma.done.wait [#allocation3], 2048  }
   0x6   :  { %1187 = vsyncadd [#allocation3], 4294965248  ;;  %v1193_v0 = vmov 0   ;;  %v55_v1 = vld [vmem:[%s1410_s1 + $0x10] sm:$0xff]  ;;  %v53_v2 = vld [vmem:[%s1410_s1] sm:$0xff]  ;;  %vm148_vm0 = vcmask 1041409  }
   0x7   :  { %1087 = vset.pattern.permute.xlu1 %v1193_v0  ;;  %1086 = vset.pattern.permute.xlu0 %v1193_v0  ;;  %v1242_v3 = vld [vmem:[%s1413_s4] sm:$0xff]  ;;  %v56_v4 = vld [vmem:[%s1410_s1 + $0x18] sm:$0xff]  ;;  %v54_v5 = vld [vmem:[%s1410_s1 + $0x8] sm:$0xff]  ;;  %vm153_vm1 = vcmask 1041408   ;;  %vm313_vm10 = vcmask 130112   ;;  %vm317_vm11 = vcmask 195712  }
   0x8   :  { %1088 = vset.pattern.permute.xlu2 %v1193_v0  ;;  %76 = vperm.xlu1 %1087, %v55_v1   ;;  %1077 = vpush %v1242_v3  ;;  %v1251_v8 = vld [vmem:[#allocation2] sm:$0xff]  ;;  %v1253_v9 = vld [vmem:[#allocation2 + $0x8] sm:$0xff]  ;;  %v1261_v13 = vld [vmem:[#allocation2 + $0x10] sm:$0xff]  ;;  %vm321_vm12 = vcmask 261312   ;;  %vm331_vm13 = vcmask 261120   ;;  %vm519_vm14 = vcmask 58368  }
   0x9   :  { %66 = vperm.xlu0 %1086, %v53_v2   ;;  %v1255_v10 = vld [vmem:[#allocation2 + $0x20] sm:$0xff]  ;;  %v1259_v12 = vld [vmem:[#allocation2 + $0x48] sm:$0xff]  ;;  %v1263_v14 = vld [vmem:[#allocation2 + $0x18] sm:$0xff]  ;;  %s1063_s25 = sshll.u32 %s1414_s5, 4  ;;  %s1064_s25 = int_to_ptr.hbm [resolvable:$true] %s1063_s25 }
   0xa   :  { %v1257_v11 = vld [vmem:[#allocation2 + $0x40] sm:$0xff]  ;;  %v1265_v15 = vld [vmem:[#allocation2 + $0x50] sm:$0xff]  ;;  %v1267_v16 = vld [vmem:[#allocation2 + $0x58] sm:$0xff] }
   0xb   :  { %v1269_v17 = vld [vmem:[#allocation2 + $0x28] sm:$0xff]  ;;  %v1271_v18 = vld [vmem:[#allocation2 + $0x60] sm:$0xff]  ;;  %v1279_v25 = vld [vmem:[#allocation2 + $0x30] sm:$0xff] }
   0xc   :  { %v1273_v19 = vld [vmem:[#allocation2 + $0x68] sm:$0xff]  ;;  %v1281_v27 = vld [vmem:[#allocation2 + $0x38] sm:$0xff]  ;;  %v1283_v28 = vld [vmem:[#allocation2 + $0x70] sm:$0xff] }
   0xd   :  { %v1285_v29 = vld [vmem:[#allocation2 + $0x78] sm:$0xff] }
  0x10   :  { %81 = vperm.xlu1 %1087, %v56_v4  }
  0x11   :  { %71 = vperm.xlu0 %1086, %v54_v5  }
  0x39   :  { %s1078_s1 = spop %1077 }
  0x7a   :  { %v77_v6 = vpop.permute.xlu1 %76 }
  0x7b   :  { %v67_v7 = vpop.permute.xlu0 %66  ;;  %v88_v34 = vmul.f32 %v77_v6, %v1255_v10  ;;  %v89_v35 = vmul.f32 %v77_v6, %v1269_v17  ;;  %v96_v36 = vmul.f32 %v77_v6, %v1271_v18  ;;  %v97_v37 = vmul.f32 %v77_v6, %v1273_v19 }
  0x7c   :  { %v84_v21 = vmul.f32 %v67_v7, %v1251_v8  ;;  %v85_v22 = vmul.f32 %v67_v7, %v1253_v9  ;;  %v92_v23 = vmul.f32 %v67_v7, %v1257_v11  ;;  %v93_v24 = vmul.f32 %v67_v7, %v1259_v12 }
  0x82   :  { %v82_v26 = vpop.permute.xlu1 %81 }
  0x83   :  { %v72_v20 = vpop.permute.xlu0 %71  ;;  %v90_v42 = vmul.f32 %v82_v26, %v1279_v25  ;;  %v91_v43 = vmul.f32 %v82_v26, %v1281_v27  ;;  %v98_v44 = vmul.f32 %v82_v26, %v1283_v28  ;;  %v99_v45 = vmul.f32 %v82_v26, %v1285_v29 }
  0x84   :  { %v86_v30 = vmul.f32 %v72_v20, %v1261_v13  ;;  %v87_v31 = vmul.f32 %v72_v20, %v1263_v14  ;;  %v94_v32 = vmul.f32 %v72_v20, %v1265_v15  ;;  %v95_v33 = vmul.f32 %v72_v20, %v1267_v16 }
  0x86   :  { %v100_v38 = vadd.f32 %v86_v30, %v84_v21  ;;  %v109_v39 = vadd.f32 %v87_v31, %v85_v22  ;;  %v118_v40 = vadd.f32 %v94_v32, %v92_v23  ;;  %v127_v41 = vadd.f32 %v95_v33, %v93_v24 }
  0x87   :  { %v138_v23 = vstv %s1078_s1 }
  0x88   :  { %v101_v46 = vadd.f32 %v100_v38, %v88_v34  ;;  %v110_v47 = vadd.f32 %v109_v39, %v89_v35  ;;  %v119_v48 = vadd.f32 %v118_v40, %v96_v36  ;;  %v128_v49 = vadd.f32 %v127_v41, %v97_v37 }
  0x8a   :  { %v102_v50 = vadd.f32 %v101_v46, %v90_v42  ;;  %v111_v51 = vadd.f32 %v110_v47, %v91_v43  ;;  %v120_v52 = vadd.f32 %v119_v48, %v98_v44  ;;  %v129_v53 = vadd.f32 %v128_v49, %v99_v45 }
  0x8c   :  { %v103_v54 = vrot.slane %v102_v50, 4  ;;  %v112_v55 = vrot.slane %v111_v51, 4  ;;  %v121_v56 = vrot.slane %v120_v52, 4  ;;  %v130_v57 = vrot.slane %v129_v53, 4 }
  0x8e   :  { %v104_v58 = vadd.f32 %v103_v54, %v102_v50  ;;  %v113_v59 = vadd.f32 %v112_v55, %v111_v51  ;;  %v122_v60 = vadd.f32 %v121_v56, %v120_v52  ;;  %v131_v61 = vadd.f32 %v130_v57, %v129_v53 }
  0x90   :  { %v105_v62 = vrot.slane %v104_v58, 2  ;;  %v114_v63 = vrot.slane %v113_v59, 2  ;;  %v123_v0 = vrot.slane %v122_v60, 2  ;;  %v132_v1 = vrot.slane %v131_v61, 2 }
  0x92   :  { %v106_v2 = vadd.f32 %v105_v62, %v104_v58  ;;  %v115_v4 = vadd.f32 %v114_v63, %v113_v59  ;;  %v124_v5 = vadd.f32 %v123_v0, %v122_v60  ;;  %v133_v6 = vadd.f32 %v132_v1, %v131_v61 }
  0x94   :  { %v107_v7 = vrot.slane %v106_v2, 1  ;;  %v116_v20 = vrot.slane %v115_v4, 1  ;;  %v125_v21 = vrot.slane %v124_v5, 1  ;;  %v134_v22 = vrot.slane %v133_v6, 1 }
  0x96   :  { %v108_v24 = vadd.f32 %v107_v7, %v106_v2  ;;  %v117_v26 = vadd.f32 %v116_v20, %v115_v4  ;;  %v126_v30 = vadd.f32 %v125_v21, %v124_v5  ;;  %v135_v31 = vadd.f32 %v134_v22, %v133_v6 }
  0x98   :  { %v140_v32 = vadd.f32 %v138_v23, %v108_v24  ;;  %v141_v33 = vadd.f32 %v138_v23, %v117_v26  ;;  %v142_v34 = vadd.f32 %v138_v23, %v126_v30  ;;  %v143_v35 = vadd.f32 %v138_v23, %v135_v31 }
  0x9a   :  { %v149_v36 = vsel %vm148_vm0, %v142_v34, %v140_v32  ;;  %v150_v37 = vsel %vm148_vm0, %v143_v35, %v141_v33 }
  0x9b   :  { %v154_v38 = vsel %vm153_vm1, %v149_v36, -inf  ;;  %v155_v39 = vsel %vm153_vm1, %v150_v37, -inf }
  0x9c   :  { %v156_v40 = vmax.f32 %v154_v38, %v155_v39 }
  0x9e   :  { %157 = vmax.xlane.f32.xlu2 %v156_v40 }
 0x111   :  { %v158_v41 = vpop.xlane.xlu2 %157 }
 0x112   :  { %v160_v42 = vrot.slane %v158_v41, 1  ;;  %v163_v43 = vsub.f32 %v140_v32, %v158_v41  ;;  %v164_v44 = vsub.f32 %v141_v33, %v158_v41 }
 0x114   :  { %v167_v45 = vmul.f32 1.442695, %v163_v43  ;;  %v169_v46 = vmul.f32 1.442695, %v164_v44  ;;  %v165_v47 = vsub.f32 %v142_v34, %v160_v42  ;;  %v166_v48 = vsub.f32 %v143_v35, %v160_v42 }
 0x116   :  { %1102 = vpow2.f32 %v167_v45  ;;  %v171_v49 = vmul.f32 1.442695, %v165_v47  ;;  %v173_v50 = vmul.f32 1.442695, %v166_v48 }
 0x117   :  { %1104 = vpow2.f32 %v169_v46 }
 0x118   :  { %1106 = vpow2.f32 %v171_v49 }
 0x119   :  { %1108 = vpow2.f32 %v173_v50 }
 0x11c   :  { %v1103_v51 = vpop.eup %1102 }
 0x11d   :  { %v1105_v52 = vpop.eup %1104  ;;  %v190_v53 = vperm.slane %v1103_v51, 0 }
 0x11e   :  { %v191_v54 = vperm.slane %v1105_v52, 0  ;;  %v1107_v0 = vpop.eup %1106 }
 0x11f   :  { %v198_v55 = vmul.f32 %v190_v53, %v1255_v10  ;;  %v196_v56 = vmul.f32 %v190_v53, %v1261_v13  ;;  %v194_v57 = vmul.f32 %v190_v53, %v1251_v8  ;;  %v1109_v1 = vpop.eup %1108  ;;  %v200_v10 = vmul.f32 %v190_v53, %v1279_v25 }
 0x120   :  { %v199_v58 = vmul.f32 %v191_v54, %v1269_v17  ;;  %v197_v59 = vmul.f32 %v191_v54, %v1263_v14  ;;  %v195_v60 = vmul.f32 %v191_v54, %v1253_v9  ;;  %v201_v13 = vmul.f32 %v191_v54, %v1281_v27 }
 0x121   :  { %v179_v2 = vrot.slane %v1107_v0, 7  ;;  %v181_v8 = vrot.slane %v1109_v1, 7  ;;  %v192_v7 = vperm.slane %v1107_v0, 0  ;;  %v193_v20 = vperm.slane %v1109_v1, 0 }
 0x122   :  { %v216_v61 = vadd.f32 %v199_v58, %v198_v55  ;;  %v213_v62 = vadd.f32 %v197_v59, %v196_v56  ;;  %v210_v63 = vadd.f32 %v195_v60, %v194_v57  ;;  %v219_v4 = vadd.f32 %v201_v13, %v200_v10 }
 0x123   :  { %v180_v14 = vsel %vm148_vm0, %v179_v2, %v1103_v51  ;;  %v182_v9 = vsel %vm148_vm0, %v181_v8, %v1105_v52  ;;  %v202_v21 = vmul.f32 %v192_v7, %v1257_v11  ;;  %v203_v22 = vmul.f32 %v193_v20, %v1259_v12 }
 0x124   :  { %217 = vadd.xlane.f32.xlu2 %v216_v61  ;;  %214 = vadd.xlane.f32.xlu1 %v213_v62  ;;  %v185_v17 = vsel %vm153_vm1, %v180_v14, 0.0  ;;  %v186_v5 = vsel %vm153_vm1, %v182_v9, 0.0  ;;  %v204_v24 = vmul.f32 %v192_v7, %v1265_v15  ;;  %v205_v26 = vmul.f32 %v193_v20, %v1267_v16  ;;  %v59_v9 = vld [vmem:[%s1411_s2 + $0x10] sm:$0xff] }
 0x125   :  { %211 = vadd.xlane.f32.xlu0 %v210_v63  ;;  %v187_v6 = vadd.f32 %v186_v5, %v185_v17  ;;  %v222_v23 = vadd.f32 %v203_v22, %v202_v21  ;;  %v206_v31 = vmul.f32 %v192_v7, %v1271_v18  ;;  %v207_v32 = vmul.f32 %v193_v20, %v1273_v19  ;;  %v57_v22 = vld [vmem:[%s1411_s2] sm:$0xff] }
 0x126   :  { %v225_v30 = vadd.f32 %v205_v26, %v204_v24  ;;  %v208_v34 = vmul.f32 %v192_v7, %v1283_v28  ;;  %v209_v11 = vmul.f32 %v193_v20, %v1285_v29  ;;  %v308_v10 = vlaneseq }
 0x127   :  { %v228_v33 = vadd.f32 %v207_v32, %v206_v31  ;;  %v348_v5 = vand.u32 4294901760, %v59_v9 }
 0x128   :  { %v231_v35 = vadd.f32 %v209_v11, %v208_v34  ;;  %v1323_v8 = vshrl.u32 %v308_v10, 7 }
 0x129   :  { %v382_v20 = vsub.f32 %v59_v9, %v348_v5 }
 0x12b   :  { %v383_v24 = vand.u32 4294901760, %v382_v20 }
 0x12c   :  { %220 = vadd.xlane.f32.xlu2 %v219_v4  ;;  %v60_v4 = vld [vmem:[%s1411_s2 + $0x18] sm:$0xff] }
 0x12d   :  { %v346_v14 = vand.u32 4294901760, %v60_v4  ;;  %v384_v32 = vsub.f32 %v382_v20, %v383_v24 }
 0x12f   :  { %v376_v17 = vsub.f32 %v60_v4, %v346_v14  ;;  %447 = vmatpush.msra.mxu3 %v346_v14  ;;  %347 = vmatpush.msra.mxu0 %v346_v14  ;;  %v385_v11 = vand.u32 4294901760, %v384_v32 }
 0x131   :  { %v377_v7 = vand.u32 4294901760, %v376_v17  ;;  %418 = vmatpush.msra.mxu2 %v376_v17  ;;  %449 = vmatpush.msra.mxu3 %v348_v5 }
 0x132   :  { %349 = vmatpush.msra.mxu0 %v348_v5 }
 0x133   :  { %421 = vmatpush.msra.mxu2 %v382_v20 }
 0x134   :  { %188 = vadd.xlane.f32.xlu2 %v187_v6  ;;  %v58_v6 = vld [vmem:[%s1411_s2 + $0x8] sm:$0xff]  ;;  %s1194_s2 = smov 120  }
 0x135   :  { %v350_v21 = vand.u32 4294901760, %v58_v6 }
 0x137   :  { %v388_v26 = vsub.f32 %v58_v6, %v350_v21  ;;  %451 = vmatpush.msra.mxu3 %v350_v21  ;;  %351 = vmatpush.msra.mxu0 %v350_v21 }
 0x139   :  { %424 = vmatpush.msra.mxu2 %v388_v26 }
 0x13c   :  { %223 = vadd.xlane.f32.xlu2 %v222_v23  ;;  %v378_v23 = vsub.f32 %v376_v17, %v377_v7 }
 0x13e   :  { %v379_v31 = vand.u32 4294901760, %v378_v23 }
 0x140   :  { %380 = vmatpush.msra.mxu1 %v379_v31 }
 0x142   :  { %386 = vmatpush.msra.mxu1 %v385_v11 }
 0x144   :  { %226 = vadd.xlane.f32.xlu2 %v225_v30  ;;  %v352_v30 = vand.u32 4294901760, %v57_v22 }
 0x146   :  { %v394_v34 = vsub.f32 %v57_v22, %v352_v30  ;;  %453 = vmatpush.msra.mxu3 %v352_v30  ;;  %353 = vmatpush.msra.mxu0 %v352_v30 }
 0x148   :  { %476 = vmatpush.msrb.mxu0 %v377_v7  ;;  %427 = vmatpush.msra.mxu2 %v394_v34 }
 0x14a   :  { %480 = vmatpush.msrb.mxu0 %v383_v24 }
 0x14c   :  { %229 = vadd.xlane.f32.xlu2 %v228_v33  ;;  %v389_v33 = vand.u32 4294901760, %v388_v26 }
 0x14e   :  { %484 = vmatpush.msrb.mxu0 %v389_v33 }
 0x154   :  { %232 = vadd.xlane.f32.xlu2 %v231_v35  ;;  %v390_v35 = vsub.f32 %v388_v26, %v389_v33 }
 0x197   :  { %v218_v12 = vpop.xlane.xlu2 %217  ;;  %v215_v53 = vpop.xlane.xlu1 %214 }
 0x198   :  { %v212_v54 = vpop.xlane.xlu0 %211 }
 0x19f   :  { %v221_v36 = vpop.xlane.xlu2 %220 }
 0x1a7   :  { %v189_v37 = vpop.xlane.xlu2 %188 }
 0x1a8   :  { %v235_v15 = vperm.slane %v189_v37, 0  ;;  %v236_v38 = vperm.slane %v189_v37, 1 }
 0x1aa   :  { %1110 = vrcp.f32 %v235_v15  ;;  %v250_v43 = vand.u32 2147483648, %v235_v15  ;;  %v268_v28 = vand.u32 2147483648, %v236_v38  ;;  %v248_v29 = vand.u32 2147483647, %v235_v15 }
 0x1ab   :  { %1112 = vrcp.f32 %v236_v38  ;;  %v266_v46 = vand.u32 2147483647, %v236_v38  ;;  %vm244_vm4 = vweird.f32 %v235_v15  ;;  %vm262_vm5 = vweird.f32 %v236_v38 }
 0x1ac   :  { %v251_v50 = vor.u32 1.1754944e-38, %v250_v43  ;;  %v269_v51 = vor.u32 1.1754944e-38, %v268_v28  ;;  %vm249_vm8 = vcmp.eq.f32.partialorder %v248_v29, 8.507059e+37 }
 0x1ad   :  { %vm267_vm9 = vcmp.eq.f32.partialorder %v266_v46, 8.507059e+37 }
 0x1af   :  { %v224_v16 = vpop.xlane.xlu2 %223 }
 0x1b0   :  { %v1111_v39 = vpop.eup %1110 }
 0x1b1   :  { %v1113_v18 = vpop.eup %1112  ;;  %v240_v40 = vmul.f32 %v1111_v39, %v235_v15  ;;  %vm245_vm2 = vweird.f32 %v1111_v39 }
 0x1b2   :  { %v258_v19 = vmul.f32 %v1113_v18, %v236_v38  ;;  %vm263_vm3 = vweird.f32 %v1113_v18  ;;  %vm246_vm6 = vmor %vm244_vm4, %vm245_vm2 }
 0x1b3   :  { %v241_v41 = vsub.f32 1.0, %v240_v40  ;;  %vm264_vm7 = vmor %vm262_vm5, %vm263_vm3  ;;  %vm588_vm3 = vcmask 64512  }
 0x1b4   :  { %v259_v42 = vsub.f32 1.0, %v258_v19 }
 0x1b5   :  { %v242_v44 = vmul.f32 %v1111_v39, %v241_v41 }
 0x1b6   :  { %v260_v45 = vmul.f32 %v1113_v18, %v259_v42 }
 0x1b7   :  { %v227_v47 = vpop.xlane.xlu2 %226  ;;  %v243_v48 = vadd.f32 %v1111_v39, %v242_v44 }
 0x1b8   :  { %v261_v49 = vadd.f32 %v1113_v18, %v260_v45 }
 0x1b9   :  { %v247_v52 = vsel %vm246_vm6, %v1111_v39, %v243_v48 }
 0x1ba   :  { %v265_v55 = vsel %vm264_vm7, %v1113_v18, %v261_v49  ;;  %v252_v56 = vsel %vm249_vm8, %v251_v50, %v247_v52  ;;  %v309_v18 = vand.u32 127, %v308_v10  ;;  %v275_v10 = vperm.slane %v1242_v3, 1 }
 0x1bb   :  { %v270_v57 = vsel %vm267_vm9, %v269_v51, %v265_v55  ;;  %v254_v58 = vmul.f32 %v252_v56, %v215_v53  ;;  %v253_v59 = vmul.f32 %v252_v56, %v212_v54  ;;  %v255_v63 = vmul.f32 %v252_v56, %v218_v12 }
 0x1bc   :  { %v271_v60 = vmul.f32 %v270_v57, %v224_v16  ;;  %v272_v62 = vmul.f32 %v270_v57, %v227_v47  ;;  %v256_v0 = vmul.f32 %v252_v56, %v221_v36  ;;  %v395_v12 = vand.u32 4294901760, %v394_v34 }
 0x1bd   :  { %288 = vperm.xlu1 %1087, %v254_v58   ;;  %285 = vperm.xlu0 %1086, %v253_v59   ;;  %v391_v36 = vand.u32 4294901760, %v390_v35  ;;  %v311_v40 = vadd.s32 4294967288, %v309_v18  ;;  %v315_v42 = vadd.s32 4294967280, %v309_v18  ;;  %v319_v29 = vadd.s32 4294967272, %v309_v18 }
 0x1be   :  { %297 = vperm.xlu2 %1088, %v271_v60   ;;  %v396_v37 = vsub.f32 %v394_v34, %v395_v12  ;;  %488 = vmatpush.msrb.mxu0 %v395_v12 }
 0x1bf   :  { %v230_v61 = vpop.xlane.xlu2 %229  ;;  %392 = vmatpush.msra.mxu1 %v391_v36 }
 0x1c0   :  { %v273_v13 = vmul.f32 %v270_v57, %v230_v61  ;;  %v397_v15 = vand.u32 4294901760, %v396_v37 }
 0x1c2   :  { %398 = vmatpush.msra.mxu1 %v397_v15 }
 0x1c4   :  { %507 = vmatpush.msrb.mxu1 %v346_v14 }
 0x1c5   :  { %291 = vperm.xlu1 %1087, %v255_v63   ;;  %300 = vperm.xlu0 %1086, %v272_v62  }
 0x1c6   :  { %294 = vperm.xlu2 %1088, %v256_v0   ;;  %509 = vmatpush.msrb.mxu1 %v348_v5 }
 0x1c7   :  { %v233_v1 = vpop.xlane.xlu2 %232 }
 0x1c8   :  { %v274_v2 = vmul.f32 %v270_v57, %v233_v1  ;;  %511 = vmatpush.msrb.mxu1 %v350_v21 }
 0x1ca   :  { %513 = vmatpush.msrb.mxu1 %v352_v30  ;;  %v1195_v30 = vmov 8.0  }
 0x1cb   :  { %1114 = vrcp.f32 %v1195_v30 }
 0x1cd   :  { %303 = vperm.xlu0 %1086, %v273_v13   ;;  %306 = vperm.xlu1 %1087, %v274_v2  }
 0x1ce   :  { %1089 = vset.pattern.permute.xlu2 %v1323_v8 }
 0x1d1   :  { %v1115_v31 = vpop.eup %1114 }
 0x1d2   :  { %v524_v32 = vmul.f32 8.0, %v1115_v31  ;;  %vm528_vm15 = vweird.f32 %v1115_v31 }
 0x1d4   :  { %v525_v33 = vsub.f32 1.0, %v524_v32 }
 0x1d6   :  { %v526_v34 = vmul.f32 %v1115_v31, %v525_v33 }
 0x1d8   :  { %v527_v11 = vadd.f32 %v1115_v31, %v526_v34 }
 0x1da   :  { %v1343_v35 = vsel %vm528_vm15, %v1115_v31, %v527_v11  ;;  %v1373_v11 = vadd.s32 24, %v1323_v8 }
 0x218   :  { %v298_v39 = vpop.permute.xlu2 %297 }
 0x219   :  { %v323_v47 = vperm.slane %v298_v39, %v309_v18 }
 0x220   :  { %v295_v46 = vpop.permute.xlu2 %294 }
 0x221   :  { %v320_v54 = vperm.slane %v295_v46, %v319_v29 }
 0x22f   :  { %v289_v38 = vpop.permute.xlu1 %288  ;;  %v286_v16 = vpop.permute.xlu0 %285 }
 0x230   :  { %v312_v43 = vperm.slane %v289_v38, %v311_v40  ;;  %v310_v28 = vperm.slane %v286_v16, %v309_v18 }
 0x232   :  { %v314_v48 = vsel %vm313_vm10, %v312_v43, %v310_v28 }
 0x237   :  { %v292_v19 = vpop.permute.xlu1 %291  ;;  %v301_v41 = vpop.permute.xlu0 %300 }
 0x238   :  { %v316_v44 = vperm.slane %v292_v19, %v315_v42  ;;  %v324_v45 = vperm.slane %v301_v41, %v311_v40  ;;  %v61_v19 = vld [vmem:[%s1412_s3] sm:$0xff] }
 0x239   :  { %v607_v41 = vand.u32 4294901760, %v61_v19 }
 0x23a   :  { %v318_v51 = vsel %vm317_vm11, %v316_v44, %v314_v48  ;;  %v325_v55 = vsel %vm313_vm10, %v324_v45, %v323_v47 }
 0x23b   :  { %v322_v57 = vsel %vm321_vm12, %v320_v54, %v318_v51  ;;  %608 = vmatpush.msrb.mxu2 %v607_v41 }
 0x23f   :  { %v304_v49 = vpop.permute.xlu0 %303  ;;  %v307_v50 = vpop.permute.xlu1 %306 }
 0x240   :  { %v326_v52 = vperm.slane %v304_v49, %v315_v42  ;;  %v328_v53 = vperm.slane %v307_v50, %v319_v29  ;;  %v634_v42 = vsub.f32 %v61_v19, %v607_v41 }
 0x242   :  { %v327_v56 = vsel %vm317_vm11, %v326_v52, %v325_v55  ;;  %v635_v43 = vand.u32 4294901760, %v634_v42 }
 0x243   :  { %v329_v58 = vsel %vm321_vm12, %v328_v53, %v327_v56  ;;  %v549_v53 = vperm.slane %v1242_v3, 2  ;;  %v551_v56 = vperm.slane %v1242_v3, 3 }
 0x244   :  { %v330_v59 = vsel %vm148_vm0, %v329_v58, %v322_v57  ;;  %v636_v44 = vsub.f32 %v634_v42, %v635_v43 }
 0x245   :  { %v332_v60 = vsel %vm331_vm13, %v330_v59, 0 }
 0x246   :  { %v354_v61 = vand.u32 4294901760, %v332_v60  ;;  %v637_v45 = vand.u32 4294901760, %v636_v44 }
 0x248   :  { %400 = vmatmul.f32.vlgmr.msra.gmra.mxu1 %v354_v61  ;;  %v355_v62 = vsub.f32 %v332_v60, %v354_v61  ;;  %638 = vmatpush.msrb.mxu3 %v637_v45 }
 0x249   :  { %684 = vmatpush.msra.mxu1 %v607_v41 }
 0x24a   :  { %430 = vmatmul.f32.vlgmr.msra.gmra.mxu2 %v355_v62  ;;  %v356_v63 = vand.u32 4294901760, %v355_v62 }
 0x24b   :  { %710 = vmatpush.msra.mxu2 %v635_v43  ;;  %v62_v43 = vld [vmem:[%s1412_s3 + $0x8] sm:$0xff]  ;;  %s1196_s3 = smov [#allocation5]  }
 0x24c   :  { %457 = vmatmul.f32.vlgmr.msra.gmra.mxu3 %v356_v63  ;;  %v357_v0 = vsub.f32 %v355_v62, %v356_v63  ;;  %s1061_s20 = sshll.u32 %s1196_s3, 4  ;;  %s1062_s20 = int_to_ptr.vmem [resolvable:$true] %s1061_s20 }
 0x24d   :  { %732 = vmatpush.msra.mxu3 %v607_v41 }
 0x24e   :  { %v358_v1 = vand.u32 4294901760, %v357_v0 }
 0x250   :  { %359 = vmatmul.f32.vlgmr.msra.gmra.mxu0 %v358_v1  ;;  %515 = vmatmul.f32.vlgmr.msrb.gmra.mxu1 %v354_v61 }
 0x251   :  { %661 = vmatpush.msra.mxu0 %v634_v42 }
 0x258   :  { %490 = vmatmul.f32.vlgmr.msrb.gmra.mxu0 %v354_v61 }
 0x2c5   :  { %v401_v13 = vpop.f32.mrf.mxu1 }
 0x2cd   :  { %v360_v2 = vpop.f32.mrf.mxu0  ;;  %v431_v9 = vpop.f32.mrf.mxu2 }
 0x2ce   :  { %v361_v4 = vadd.f32 %v360_v2, %v275_v10  ;;  %v516_v21 = vpop.f32.mrf.mxu1  ;;  %v924_v2 = vadd.s32 16, %v1323_v8 }
 0x2cf   :  { %v458_v5 = vpop.f32.mrf.mxu3 }
 0x2d0   :  { %v402_v14 = vadd.f32 %v401_v13, %v361_v4  ;;  %1091 = vset.pattern.permute.xlu1 %v924_v2  ;;  %v587_v4 = vperm.slane %v1242_v3, 4 }
 0x2d2   :  { %v432_v17 = vadd.f32 %v431_v9, %v402_v14 }
 0x2d4   :  { %v459_v6 = vadd.f32 %v458_v5, %v432_v17 }
 0x2d5   :  { %v491_v7 = vpop.f32.mrf.mxu0 }
 0x2d6   :  { %v492_v20 = vadd.f32 %v491_v7, %v459_v6 }
 0x2d8   :  { %v517_v22 = vadd.f32 %v516_v21, %v492_v20  ;;  %v1368_v21 = vadd.s32 8, %v1323_v8 }
 0x2da   :  { %555 = vrot.lane.b32.xlu0 %v517_v22, %s1194_s2  ;;  %v520_v23 = vsel %vm519_vm14, %v517_v22, 0.0 }
 0x2db   :  { %1090 = vset.pattern.permute.xlu0 %v1368_v21 }
 0x304   :  { %521 = vadd.xlane.f32.xlu0 %v520_v23 }
 0x34c   :  { %v556_v24 = vpop.permute.xlu0 %555 }
 0x34d   :  { %v558_v26 = vsel %vm519_vm14, %v556_v24, 0.0 }
 0x34e   :  { %559 = vadd.xlane.f32.xlu2 %v558_v26 }
 0x377   :  { %v522_v12 = vpop.xlane.xlu0 %521 }
 0x378   :  { %v530_v36 = vmul.f32 %v1343_v35, %v522_v12 }
 0x37a   :  { %v531_v37 = vsub.f32 %v517_v22, %v530_v36 }
 0x37c   :  { %v532_v15 = vmul.f32 %v531_v37, %v531_v37 }
 0x37e   :  { %v533_v38 = vsel %vm519_vm14, %v532_v15, 0.0 }
 0x37f   :  { %534 = vadd.xlane.f32.xlu2 %v533_v38 }
 0x3c1   :  { %v560_v16 = vpop.xlane.xlu2 %559 }
 0x3c2   :  { %v561_v39 = vmul.f32 %v560_v16, %v1343_v35 }
 0x3c4   :  { %v1348_v18 = vsub.f32 %v517_v22, %v561_v39 }
 0x3c6   :  { %v563_v40 = vmul.f32 %v1348_v18, %v1348_v18 }
 0x3c8   :  { %565 = vrot.lane.b32.xlu1 %v563_v40, %s1194_s2 }
 0x3f2   :  { %v535_v28 = vpop.xlane.xlu2 %534 }
 0x3f3   :  { %v536_v29 = vmul.f32 %v535_v28, %v1343_v35 }
 0x3f5   :  { %v537_v46 = vadd.f32 1e-05, %v536_v29 }
 0x3f7   :  { %1116 = vrsqrt.f32 %v537_v46  ;;  %vm544_vm1 = vweird.f32 %v537_v46 }
 0x3fd   :  { %v1117_v47 = vpop.eup %1116 }
 0x3fe   :  { %v539_v48 = vmul.f32 %v1117_v47, %v537_v46  ;;  %vm545_vm0 = vweird.f32 %v1117_v47 }
 0x3ff   :  { %vm546_vm2 = vmor %vm544_vm1, %vm545_vm0 }
 0x400   :  { %v540_v49 = vmul.f32 %v1117_v47, %v539_v48 }
 0x402   :  { %v541_v50 = vmul.f32 0.5, %v540_v49 }
 0x404   :  { %v542_v51 = vsub.f32 1.5, %v541_v50 }
 0x406   :  { %v543_v52 = vmul.f32 %v1117_v47, %v542_v51 }
 0x408   :  { %v547_v54 = vsel %vm546_vm2, %v1117_v47, %v543_v52 }
 0x409   :  { %v548_v55 = vmul.f32 %v547_v54, %v531_v37 }
 0x40b   :  { %v550_v57 = vmul.f32 %v549_v53, %v548_v55 }
 0x40d   :  { %v552_v58 = vadd.f32 %v551_v56, %v550_v57 }
 0x40f   :  { %v553_v59 = vmax.f32 %v552_v58, 0.0 }
 0x411   :  { %v590_v60 = vsel %vm588_vm3, %v553_v59, 0 }
 0x412   :  { %v609_v61 = vand.u32 4294901760, %v590_v60 }
 0x414   :  { %640 = vmatmul.f32.vlgmr.msrb.gmra.mxu3 %v609_v61  ;;  %v610_v62 = vsub.f32 %v590_v60, %v609_v61 }
 0x416   :  { %664 = vmatmul.f32.vlgmr.msra.gmra.mxu0 %v610_v62  ;;  %v611_v63 = vand.u32 4294901760, %v610_v62 }
 0x418   :  { %688 = vmatmul.f32.vlgmr.msra.gmra.mxu1 %v611_v63  ;;  %v612_v0 = vsub.f32 %v610_v62, %v611_v63 }
 0x41a   :  { %v613_v1 = vand.u32 4294901760, %v612_v0 }
 0x41c   :  { %614 = vmatmul.f32.vlgmr.msrb.gmra.mxu2 %v613_v1  ;;  %734 = vmatmul.f32.vlgmr.msra.gmra.mxu3 %v609_v61 }
 0x424   :  { %712 = vmatmul.f32.vlgmr.msra.gmra.mxu2 %v609_v61 }
 0x43a   :  { %v566_v10 = vpop.permute.xlu1 %565 }
 0x43b   :  { %v568_v13 = vsel %vm519_vm14, %v566_v10, 0.0 }
 0x43c   :  { %569 = vadd.xlane.f32.xlu1 %v568_v13 }
 0x493   :  { %v665_v6 = vpop.f32.mrf.mxu0 }
 0x495   :  { %v689_v20 = vpop.f32.mrf.mxu1 }
 0x497   :  { %v641_v14 = vpop.f32.mrf.mxu3 }
 0x49f   :  { %v615_v9 = vpop.f32.mrf.mxu2  ;;  %v735_v26 = vpop.f32.mrf.mxu3 }
 0x4a0   :  { %v616_v17 = vadd.f32 %v615_v9, %v587_v4 }
 0x4a2   :  { %v642_v5 = vadd.f32 %v641_v14, %v616_v17 }
 0x4a4   :  { %v666_v7 = vadd.f32 %v665_v6, %v642_v5 }
 0x4a6   :  { %v690_v22 = vadd.f32 %v689_v20, %v666_v7 }
 0x4a7   :  { %v713_v23 = vpop.f32.mrf.mxu2 }
 0x4a8   :  { %v714_v24 = vadd.f32 %v713_v23, %v690_v22 }
 0x4aa   :  { %v736_v30 = vadd.f32 %v735_v26, %v714_v24 }
 0x4ac   :  { %v975_v31 = vperm.slane %v736_v30, 0  ;;  %v1377_v37 = vperm.slane %v736_v30, 1 }
 0x4ae   :  { %992 = vperm.xlu1 %1091, %v975_v31   ;;  %980 = vperm.xlu2 %1089, %v975_v31  }
 0x4af   :  { %v570_v32 = vpop.xlane.xlu1 %569 }
 0x4b0   :  { %v571_v33 = vmul.f32 %v570_v32, %v1343_v35 }
 0x4b2   :  { %v572_v34 = vadd.f32 1e-05, %v571_v33  ;;  %v1125_v33 = vld [vmem:[#allocation2 + $0x8] sm:$0xff] }
 0x4b4   :  { %1118 = vrsqrt.f32 %v572_v34  ;;  %vm579_vm5 = vweird.f32 %v572_v34 }
 0x4b6   :  { %1093 = vset.pattern.permute.xlu1 %v1323_v8  ;;  %1092 = vset.pattern.permute.xlu2 %v1373_v11 }
 0x4ba   :  { %v1119_v12 = vpop.eup %1118 }
 0x4bb   :  { %v574_v36 = vmul.f32 %v1119_v12, %v572_v34  ;;  %vm580_vm4 = vweird.f32 %v1119_v12 }
 0x4bc   :  { %vm581_vm6 = vmor %vm579_vm5, %vm580_vm4 }
 0x4bd   :  { %v575_v15 = vmul.f32 %v1119_v12, %v574_v36 }
 0x4be   :  { %1005 = vperm.xlu1 %1093, %v1377_v37   ;;  %998 = vperm.xlu2 %1092, %v975_v31  }
 0x4bf   :  { %v576_v38 = vmul.f32 0.5, %v575_v15 }
 0x4c1   :  { %v577_v16 = vsub.f32 1.5, %v576_v38 }
 0x4c3   :  { %v578_v35 = vmul.f32 %v1119_v12, %v577_v16 }
 0x4c5   :  { %v582_v39 = vsel %vm581_vm6, %v1119_v12, %v578_v35 }
 0x4c6   :  { %v583_v40 = vmul.f32 %v582_v39, %v1348_v18  ;;  %1095 = vset.pattern.permute.xlu1 %v1368_v21  ;;  %1094 = vset.pattern.permute.xlu2 %v1323_v8  ;;  %v759_v18 = vand.u32 4294901760, %v62_v43 }
 0x4c8   :  { %v584_v19 = vmul.f32 %v583_v40, %v549_v53  ;;  %v786_v28 = vsub.f32 %v62_v43, %v759_v18  ;;  %760 = vmatpush.msrb.mxu0 %v759_v18  ;;  %836 = vmatpush.msrb.mxu3 %v759_v18  ;;  %v738_v53 = vperm.slane %v1242_v3, 5  ;;  %v1127_v43 = vld [vmem:[#allocation2 + $0x18] sm:$0xff] }
 0x4ca   :  { %v585_v41 = vadd.f32 %v584_v19, %v551_v56  ;;  %813 = vmatpush.msrb.mxu2 %v786_v28  ;;  %v787_v44 = vand.u32 4294901760, %v786_v28 }
 0x4cc   :  { %v586_v42 = vmax.f32 %v585_v41, 0.0  ;;  %v788_v29 = vsub.f32 %v786_v28, %v787_v44  ;;  %862 = vmatpush.msra.mxu0 %v787_v44  ;;  %v1126_v41 = vld [vmem:[#allocation2 + $0x10] sm:$0xff]  ;;  %v1128_v28 = vld [vmem:[#allocation2 + $0x20] sm:$0xff] }
 0x4ce   :  { %740 = vrot.lane.b32.xlu0 %v586_v42, %s1194_s2  ;;  %v789_v45 = vand.u32 4294901760, %v788_v29  ;;  %v1129_v29 = vld [vmem:[#allocation2 + $0x28] sm:$0xff] }
 0x4d0   :  { %790 = vmatpush.msrb.mxu1 %v789_v45 }
 0x4d2   :  { %884 = vmatpush.msra.mxu1 %v759_v18 }
 0x4d6   :  { %986 = vperm.xlu0 %1090, %v975_v31   ;;  %v1124_v31 = vld [vmem:[#allocation2] sm:$0xff] }
 0x4de   :  { %1096 = vset.pattern.permute.xlu0 %v924_v2 }
 0x508   :  { %v981_v26 = vpop.permute.xlu2 %980 }
 0x540   :  { %v741_v46 = vpop.permute.xlu0 %740 }
 0x541   :  { %v742_v47 = vsel %vm588_vm3, %v741_v46, 0 }
 0x542   :  { %v761_v48 = vand.u32 4294901760, %v742_v47 }
 0x544   :  { %v762_v49 = vsub.f32 %v742_v47, %v761_v48  ;;  %792 = vmatmul.f32.vlgmr.msrb.gmra.mxu1 %v761_v48 }
 0x546   :  { %v763_v50 = vand.u32 4294901760, %v762_v49  ;;  %816 = vmatmul.f32.vlgmr.msrb.gmra.mxu2 %v762_v49 }
 0x548   :  { %v764_v51 = vsub.f32 %v762_v49, %v763_v50  ;;  %840 = vmatmul.f32.vlgmr.msrb.gmra.mxu3 %v763_v50  ;;  %v1130_v50 = vld [vmem:[#allocation2 + $0x60] sm:$0xff] }
 0x54a   :  { %v765_v52 = vand.u32 4294901760, %v764_v51 }
 0x54c   :  { %766 = vmatmul.f32.vlgmr.msrb.gmra.mxu0 %v765_v52  ;;  %886 = vmatmul.f32.vlgmr.msra.gmra.mxu1 %v761_v48  ;;  %v1131_v52 = vld [vmem:[#allocation2 + $0x50] sm:$0xff] }
 0x554   :  { %864 = vmatmul.f32.vlgmr.msra.gmra.mxu0 %v761_v48 }
 0x5c1   :  { %v793_v54 = vpop.f32.mrf.mxu1 }
 0x5c9   :  { %v767_v55 = vpop.f32.mrf.mxu0  ;;  %v817_v58 = vpop.f32.mrf.mxu2 }
 0x5ca   :  { %v768_v56 = vadd.f32 %v767_v55, %v738_v53  ;;  %v887_v0 = vpop.f32.mrf.mxu1 }
 0x5cb   :  { %v841_v60 = vpop.f32.mrf.mxu3 }
 0x5cc   :  { %v794_v57 = vadd.f32 %v793_v54, %v768_v56  ;;  %v1132_v56 = vld [vmem:[#allocation2 + $0x58] sm:$0xff] }
 0x5ce   :  { %v818_v59 = vadd.f32 %v817_v58, %v794_v57  ;;  %v1133_v58 = vld [vmem:[#allocation2 + $0x40] sm:$0xff] }
 0x5d0   :  { %v842_v61 = vadd.f32 %v841_v60, %v818_v59  ;;  %v1134_v60 = vld [vmem:[#allocation2 + $0x48] sm:$0xff] }
 0x5d1   :  { %v865_v62 = vpop.f32.mrf.mxu0 }
 0x5d2   :  { %v866_v63 = vadd.f32 %v865_v62, %v842_v61 }
 0x5d4   :  { %v888_v1 = vadd.f32 %v887_v0, %v866_v63  ;;  %v1135_v0 = vld [vmem:[#allocation2 + $0x68] sm:$0xff] }
 0x5d6   :  { %v1076_v10 = vmul.f32 -1.442695, %v888_v1 }
 0x5d8   :  { %1120 = vpow2.f32 %v1076_v10 }
 0x5de   :  { %v1121_v13 = vpop.eup %1120 }
 0x5df   :  { %v893_v2 = vadd.f32 1.0, %v1121_v13 }
 0x5e1   :  { %1122 = vrcp.f32 %v893_v2  ;;  %v905_v9 = vand.u32 2147483648, %v893_v2  ;;  %v903_v5 = vand.u32 2147483647, %v893_v2  ;;  %vm899_vm8 = vweird.f32 %v893_v2 }
 0x5e3   :  { %v906_v7 = vor.u32 1.1754944e-38, %v905_v9  ;;  %vm904_vm10 = vcmp.eq.f32.partialorder %v903_v5, 8.507059e+37  ;;  %v1136_v9 = vld [vmem:[#allocation2 + $0x70] sm:$0xff]  ;;  %v1137_v5 = vld [vmem:[#allocation2 + $0x78] sm:$0xff] }
 0x5e7   :  { %v1123_v4 = vpop.eup %1122 }
 0x5e8   :  { %v895_v14 = vmul.f32 %v1123_v4, %v893_v2  ;;  %vm900_vm7 = vweird.f32 %v1123_v4 }
 0x5e9   :  { %vm901_vm9 = vmor %vm899_vm8, %vm900_vm7 }
 0x5ea   :  { %v896_v3 = vsub.f32 1.0, %v895_v14 }
 0x5ec   :  { %v897_v17 = vmul.f32 %v1123_v4, %v896_v3 }
 0x5ee   :  { %v898_v6 = vadd.f32 %v1123_v4, %v897_v17 }
 0x5f0   :  { %v902_v20 = vsel %vm901_vm9, %v1123_v4, %v898_v6 }
 0x5f1   :  { %v907_v22 = vsel %vm904_vm10, %v906_v7, %v902_v20 }
 0x5f2   :  { %v909_v23 = vperm.slane %v907_v22, 0  ;;  %v934_v24 = vperm.slane %v907_v22, 1 }
 0x5f4   :  { %926 = vperm.xlu0 %1096, %v909_v23   ;;  %920 = vperm.xlu1 %1095, %v909_v23  }
 0x5f5   :  { %914 = vperm.xlu2 %1094, %v909_v23  }
 0x5fc   :  { %951 = vperm.xlu0 %1096, %v934_v24   ;;  %1098 = vset.pattern.permute.xlu1 %v1323_v8  ;;  %v999_v8 = vpop.permute.xlu2 %998 }
 0x5fd   :  { %1097 = vset.pattern.permute.xlu2 %v1373_v11 }
 0x604   :  { %1017 = vperm.xlu0 %1096, %v1377_v37   ;;  %939 = vperm.xlu1 %1098, %v934_v24  }
 0x605   :  { %932 = vperm.xlu2 %1097, %v909_v23  }
 0x60c   :  { %1100 = vset.pattern.permute.xlu1 %v1373_v11  ;;  %1101 = vset.pattern.permute.xlu0 %v1373_v11  ;;  %v993_v11 = vpop.permute.xlu1 %992 }
 0x60d   :  { %1099 = vset.pattern.permute.xlu2 %v1368_v21  ;;  %v987_v21 = vpop.permute.xlu0 %986 }
 0x614   :  { %957 = vperm.xlu1 %1100, %v934_v24   ;;  %v1006_v15 = vpop.permute.xlu1 %1005 }
 0x615   :  { %945 = vperm.xlu2 %1099, %v934_v24  }
 0x61c   :  { %1023 = vperm.xlu1 %1100, %v1377_v37  }
 0x61d   :  { %1011 = vperm.xlu2 %1099, %v1377_v37  }
 0x64f   :  { %v915_v30 = vpop.permute.xlu2 %914 }
 0x650   :  { %v959_v32 = vmul.f32 %v1124_v31, %v915_v30  ;;  %v960_v34 = vmul.f32 %v1125_v33, %v915_v30 }
 0x652   :  { %v1025_v12 = vadd.f32 %v981_v26, %v959_v32  ;;  %v1026_v36 = vadd.f32 %v981_v26, %v960_v34 }
 0x654   :  { %1041 = vst [vmem:[#allocation5] sm:$0xff] %v1025_v12 }
 0x655   :  { %1042 = vst [vmem:[#allocation5 + $0x8] sm:$0xff] %v1026_v36 }
 0x65f   :  { %v933_v38 = vpop.permute.xlu2 %932 }
 0x660   :  { %v965_v16 = vmul.f32 %v933_v38, %v1279_v25  ;;  %v966_v35 = vmul.f32 %v933_v38, %v1281_v27 }
 0x662   :  { %v1031_v37 = vadd.f32 %v999_v8, %v965_v16  ;;  %v1032_v39 = vadd.f32 %v999_v8, %v966_v35 }
 0x664   :  { %1047 = vst [vmem:[#allocation5 + $0x30] sm:$0xff] %v1031_v37 }
 0x665   :  { %1048 = vst [vmem:[#allocation5 + $0x38] sm:$0xff] %v1032_v39 }
 0x666   :  { %v921_v40 = vpop.permute.xlu1 %920  ;;  %v927_v19 = vpop.permute.xlu0 %926 }
 0x667   :  { %v961_v42 = vmul.f32 %v1126_v41, %v921_v40  ;;  %v962_v18 = vmul.f32 %v1127_v43, %v921_v40  ;;  %v963_v44 = vmul.f32 %v1128_v28, %v927_v19  ;;  %v964_v45 = vmul.f32 %v1129_v29, %v927_v19 }
 0x669   :  { %v1027_v46 = vadd.f32 %v987_v21, %v961_v42  ;;  %v1028_v47 = vadd.f32 %v987_v21, %v962_v18  ;;  %v1029_v48 = vadd.f32 %v993_v11, %v963_v44  ;;  %v1030_v25 = vadd.f32 %v993_v11, %v964_v45 }
 0x66b   :  { %1043 = vst [vmem:[#allocation5 + $0x10] sm:$0xff] %v1027_v46 }
 0x66c   :  { %1044 = vst [vmem:[#allocation5 + $0x18] sm:$0xff] %v1028_v47 }
 0x66d   :  { %1045 = vst [vmem:[#allocation5 + $0x20] sm:$0xff] %v1029_v48 }
 0x66e   :  { %1046 = vst [vmem:[#allocation5 + $0x28] sm:$0xff] %v1030_v25  ;;  %v952_v27 = vpop.permute.xlu0 %951 }
 0x66f   :  { %v946_v49 = vpop.permute.xlu2 %945  ;;  %v971_v51 = vmul.f32 %v1130_v50, %v952_v27  ;;  %v972_v1 = vmul.f32 %v1135_v0, %v952_v27 }
 0x670   :  { %v969_v53 = vmul.f32 %v1131_v52, %v946_v49  ;;  %v970_v57 = vmul.f32 %v1132_v56, %v946_v49 }
 0x676   :  { %v940_v54 = vpop.permute.xlu1 %939  ;;  %v1018_v55 = vpop.permute.xlu0 %1017 }
 0x677   :  { %v967_v59 = vmul.f32 %v1133_v58, %v940_v54  ;;  %v968_v61 = vmul.f32 %v1134_v60, %v940_v54  ;;  %v1012_v62 = vpop.permute.xlu2 %1011  ;;  %v1037_v63 = vadd.f32 %v1018_v55, %v971_v51  ;;  %v1038_v14 = vadd.f32 %v1018_v55, %v972_v1 }
 0x678   :  { %v1035_v10 = vadd.f32 %v1012_v62, %v969_v53  ;;  %v1036_v4 = vadd.f32 %v1012_v62, %v970_v57 }
 0x679   :  { %v1033_v13 = vadd.f32 %v1006_v15, %v967_v59  ;;  %v1034_v2 = vadd.f32 %v1006_v15, %v968_v61  ;;  %1053 = vst [vmem:[#allocation5 + $0x60] sm:$0xff] %v1037_v63 }
 0x67a   :  { %1051 = vst [vmem:[#allocation5 + $0x50] sm:$0xff] %v1035_v10 }
 0x67b   :  { %1049 = vst [vmem:[#allocation5 + $0x40] sm:$0xff] %v1033_v13 }
 0x67c   :  { %1050 = vst [vmem:[#allocation5 + $0x48] sm:$0xff] %v1034_v2 }
 0x67d   :  { %1052 = vst [vmem:[#allocation5 + $0x58] sm:$0xff] %v1036_v4 }
 0x67e   :  { %1054 = vst [vmem:[#allocation5 + $0x68] sm:$0xff] %v1038_v14 }
 0x686   :  { %v958_v3 = vpop.permute.xlu1 %957 }
 0x687   :  { %v973_v17 = vmul.f32 %v1136_v9, %v958_v3  ;;  %v974_v6 = vmul.f32 %v1137_v5, %v958_v3 }
 0x68e   :  { %v1024_v7 = vpop.permute.xlu1 %1023 }
 0x68f   :  { %v1039_v20 = vadd.f32 %v1024_v7, %v973_v17  ;;  %v1040_v22 = vadd.f32 %v1024_v7, %v974_v6 }
 0x691   :  { %1055 = vst [vmem:[#allocation5 + $0x70] sm:$0xff] %v1039_v20 }
 0x692   :  { %1056 = vst [vmem:[#allocation5 + $0x78] sm:$0xff] %v1040_v22 }
 0x693   :  { %1069 = dma.vmem_to_hbm [thread:$0]  %s1062_s20, 2048, %s1064_s25, [#allocation4], %s1191_s23, %s1191_s23, %s1192_s24  }
 0x694   :  { %1188 = dma.done.wait [#allocation4], 2048  }
 0x695   :  { %1189 = vsyncadd [#allocation4], 4294965248 }
 0x696   :  { %1074 = vsyncpa [#allocation3], 1 }
 0x697   :  { %1075 = vsyncpa [#allocation4], 1 }

</bundles_post_ra>
